<compile_context>
chip_gen: v7x
topology: tpu7x:2x2x1
jax: 0.10.0
libtpu: 0.0.40
codegen_flags: <defaults>
</compile_context>

<pallas_src>
import math

import jax
import jax.numpy as jnp
from jax.experimental import pallas as pl
from jax.experimental.pallas import tpu as pltpu

T_LEN = 50
D_IN = 2 + 2 * T_LEN      # 102
D_H1 = 2 + 2 * T_LEN      # 102
D_H2 = 1 + T_LEN          # 51
D_H3 = 1 + T_LEN          # 51
D_OUT = 1

P1 = 128                  # padded width for the 102-wide hidden layer
P2 = 64                   # padded width for the 51-wide hidden layers
TB_MAX = 1024             # max batch rows per grid step
NEG_SLOPE = 0.01          # F.leaky_relu default


def _leaky_relu(x):
    return jnp.where(x > 0, x, NEG_SLOPE * x)


def lennet_kernel(x_ref,
                  w1_ref, b1_ref,
                  w2_ref, b2_ref,
                  w3_ref, b3_ref,
                  w4_ref, b4_ref,
                  o_ref):
    # Cast the raw f32 activation tile to bf16 in-register (no wrapper pass).
    x = x_ref[...].astype(jnp.bfloat16)                       # (TB, 102)

    # Layers 1-3: bf16 operands on the MXU, f32 accumulation, f32 elementwise.
    h = jnp.dot(x, w1_ref[...], preferred_element_type=jnp.float32)        # (TB, 128)
    h = _leaky_relu(h + b1_ref[...])

    h = jnp.dot(h.astype(jnp.bfloat16), w2_ref[...],
                preferred_element_type=jnp.float32)                        # (TB, 64)
    h = _leaky_relu(h + b2_ref[...])

    h = jnp.dot(h.astype(jnp.bfloat16), w3_ref[...],
                preferred_element_type=jnp.float32)                        # (TB, 64)
    h = _leaky_relu(h + b3_ref[...])

    # Layer 4: tiny trans-B matmul producing a lane-dense (1, TB) row.
    # w4_ref is (8, 64) with only row 0 real (rows 1-7 zero).
    y = jax.lax.dot_general(
        w4_ref[...], h.astype(jnp.bfloat16),
        dimension_numbers=(((1,), (1,)), ((), ())),
        preferred_element_type=jnp.float32)                                # (8, TB)
    o_ref[...] = (y[0:1, :] + b4_ref[...]).astype(o_ref.dtype)             # (1, TB)


def init_params(key):
    """PyTorch nn.Linear-style init: U(-1/sqrt(fan_in), 1/sqrt(fan_in)).
    Weights stored as [in, out] (transposed from PyTorch's [out, in])."""
    dims = [(D_IN, D_H1), (D_H1, D_H2), (D_H2, D_H3), (D_H3, D_OUT)]
    params = []
    for fan_in, fan_out in dims:
        key, kw, kb = jax.random.split(key, 3)
        bound = 1.0 / math.sqrt(fan_in)
        w = jax.random.uniform(kw, (fan_in, fan_out), jnp.float32, -bound, bound)
        b = jax.random.uniform(kb, (1, fan_out), jnp.float32, -bound, bound)
        params.append((w, b))
    return params


def prepare_params(params):
    """Zero-pad feature dims (102->128 on layer 1 out, 51->64 on layers 2-4),
    cast MXU operands to bf16.  Padded rows/cols are exactly zero, so padded
    activation lanes stay exactly zero through leaky_relu."""
    (w1, b1), (w2, b2), (w3, b3), (w4, b4) = params
    w1p = jnp.pad(w1, ((0, 0), (0, P1 - D_H1))).astype(jnp.bfloat16)        # (102, 128)
    w2p = jnp.pad(w2, ((0, P1 - D_H1), (0, P2 - D_H2))).astype(jnp.bfloat16)  # (128, 64)
    w3p = jnp.pad(w3, ((0, P2 - D_H2), (0, P2 - D_H3))).astype(jnp.bfloat16)  # (64, 64)
    b1p = jnp.pad(b1, ((0, 0), (0, P1 - D_H1)))                             # (1, 128) f32
    b2p = jnp.pad(b2, ((0, 0), (0, P2 - D_H2)))                             # (1, 64)  f32
    b3p = jnp.pad(b3, ((0, 0), (0, P2 - D_H3)))                             # (1, 64)  f32
    w4p = jnp.pad(w4.T, ((0, 7), (0, P2 - D_H3))).astype(jnp.bfloat16)      # (8, 64) bf16
    b4p = b4.reshape(1, 1)                                                  # (1, 1)  f32
    return (w1p, b1p, w2p, b2p, w3p, b3p, w4p, b4p)


def _choose_tb(batch):
    """Batch tile: as large as TB_MAX, but keep >=2 grid steps when the batch
    allows it (v7x 2-core balance).  Multiple of 128 (or of 8 for tiny
    single-tile batches) so the lane-dense output BlockSpec stays legal."""
    if batch >= 2 * TB_MAX:
        return TB_MAX
    if batch < 2 * 128:
        return min(TB_MAX, ((batch + 7) // 8) * 8)          # single tile
    half = (batch + 1) // 2
    return min(TB_MAX, ((half + 127) // 128) * 128)


def lennet_forward(x, prepared):
    """x: [B, 102] float32.  Returns [B, 1] float32."""
    w1, b1, w2, b2, w3, b3, w4, b4 = prepared
    B = x.shape[0]
    tb = _choose_tb(B)
    n_tiles = pl.cdiv(B, tb)
    Bp = n_tiles * tb

    const = lambda i: (0, 0)
    layer_macs = D_IN * P1 + P1 * P2 + P2 * P2 + 8 * P2
    flops = 2 * Bp * layer_macs
    bytes_accessed = (Bp * D_IN * 4                      # x (raw f32, read in-kernel)
                      + 2 * layer_macs                   # bf16 weights
                      + (P1 + 2 * P2 + 1) * 4            # f32 biases
                      + Bp * 4)                          # output (f32)

    out = pl.pallas_call(
        lennet_kernel,
        out_shape=jax.ShapeDtypeStruct((1, Bp), jnp.float32),
        grid=(n_tiles,),
        in_specs=[
            pl.BlockSpec((tb, D_IN), lambda i: (i, 0)),   # x tile (raw f32, full 102 lanes)
            pl.BlockSpec((D_IN, P1), const),              # w1 (VMEM-resident)
            pl.BlockSpec((1, P1), const),                 # b1
            pl.BlockSpec((P1, P2), const),                # w2
            pl.BlockSpec((1, P2), const),                 # b2
            pl.BlockSpec((P2, P2), const),                # w3
            pl.BlockSpec((1, P2), const),                 # b3
            pl.BlockSpec((8, P2), const),                 # w4 (row 0 real)
            pl.BlockSpec((1, 1), const),                  # b4
        ],
        out_specs=pl.BlockSpec((1, tb), lambda i: (0, i)),  # lane-dense output row
        compiler_params=pltpu.CompilerParams(
            dimension_semantics=("parallel",)),
        cost_estimate=pl.CostEstimate(flops=flops, transcendentals=0,
                                      bytes_accessed=bytes_accessed),
    )(x, w1, b1, w2, b2, w3, b3, w4, b4)
    return out[0, :B].reshape(B, 1)


def lennet_reference(x, params):
    """Pure-JAX reference mirroring the kernel's bf16-operand / f32-accumulate
    math so it can be compared with a tight tolerance."""
    (w1, b1), (w2, b2), (w3, b3), (w4, b4) = params
    h = x
    for w, b in ((w1, b1), (w2, b2), (w3, b3)):
        h = jnp.dot(h.astype(jnp.bfloat16), w.astype(jnp.bfloat16),
                    preferred_element_type=jnp.float32) + b
        h = _leaky_relu(h)
    y = jnp.dot(h.astype(jnp.bfloat16), w4.astype(jnp.bfloat16),
                preferred_element_type=jnp.float32) + b4
    return y


if __name__ == "__main__":
    key = jax.random.PRNGKey(0)
    key, kx = jax.random.split(key)

    params = init_params(key)
    prepared = prepare_params(params)

    # B=1024: two exact 512-row tiles (both TCs busy).
    # B=300 : two tiles with a ragged trailing block (partial-block path).
    # B=8   : tiny single tile.
    for B in (1024, 300, 8):
        kx, kb = jax.random.split(kx)
        x = jax.random.normal(kb, (B, D_IN), jnp.float32)

        out = jax.block_until_ready(lennet_forward(x, prepared))
        ref = lennet_reference(x, params)

        assert out.shape == (B, D_OUT), out.shape
        assert jnp.allclose(out, ref, atol=2e-2, rtol=2e-2), (
            B, float(jnp.max(jnp.abs(out - ref))))

    print("KERNEL_OK")
</pallas_src>

<mosaic_0001>
module attributes {stable_mosaic.version = 11 : i64} {
  func.func @lennet_kernel(%arg0: i32, %arg1: memref<512x102xf32, #tpu.memory_space<vmem>>, %arg2: memref<102x128xbf16, #tpu.memory_space<vmem>>, %arg3: memref<1x128xf32, #tpu.memory_space<vmem>>, %arg4: memref<128x64xbf16, #tpu.memory_space<vmem>>, %arg5: memref<1x64xf32, #tpu.memory_space<vmem>>, %arg6: memref<64x64xbf16, #tpu.memory_space<vmem>>, %arg7: memref<1x64xf32, #tpu.memory_space<vmem>>, %arg8: memref<8x64xbf16, #tpu.memory_space<vmem>>, %arg9: memref<1x1xf32, #tpu.memory_space<vmem>>, %arg10: memref<1x512xf32, #tpu.memory_space<vmem>>) attributes {dimension_semantics = [#tpu.dimension_semantics<parallel>], iteration_bounds = array<i64: 2>, scalar_prefetch = 0 : i64, scratch_operands = 0 : i64, tpu.core_type = #tpu.core_type<tc>, window_params = [{transform_indices = @transform_0, window_bounds = array<i64: 512, 102>}, {pipeline_mode = #tpu.pipeline_mode<synchronous>, transform_indices = @transform_1, window_bounds = array<i64: 102, 128>}, {pipeline_mode = #tpu.pipeline_mode<synchronous>, transform_indices = @transform_2, window_bounds = array<i64: 1, 128>}, {pipeline_mode = #tpu.pipeline_mode<synchronous>, transform_indices = @transform_3, window_bounds = array<i64: 128, 64>}, {pipeline_mode = #tpu.pipeline_mode<synchronous>, transform_indices = @transform_4, window_bounds = array<i64: 1, 64>}, {pipeline_mode = #tpu.pipeline_mode<synchronous>, transform_indices = @transform_5, window_bounds = array<i64: 64, 64>}, {pipeline_mode = #tpu.pipeline_mode<synchronous>, transform_indices = @transform_6, window_bounds = array<i64: 1, 64>}, {pipeline_mode = #tpu.pipeline_mode<synchronous>, transform_indices = @transform_7, window_bounds = array<i64: 8, 64>}, {pipeline_mode = #tpu.pipeline_mode<synchronous>, transform_indices = @transform_8, window_bounds = array<i64: 1, 1>}, {transform_indices = @transform_9, window_bounds = array<i64: 1, 512>}]} {
    %c0 = arith.constant 0 : index
    %c0_0 = arith.constant 0 : index
    %0 = vector.load %arg1[%c0, %c0_0] : memref<512x102xf32, #tpu.memory_space<vmem>>, vector<512x102xf32>
    %1 = arith.truncf %0 : vector<512x102xf32> to vector<512x102xbf16>
    %c0_1 = arith.constant 0 : index
    %c0_2 = arith.constant 0 : index
    %2 = vector.load %arg2[%c0_1, %c0_2] : memref<102x128xbf16, #tpu.memory_space<vmem>>, vector<102x128xbf16>
    %cst = arith.constant dense<0.000000e+00> : vector<512x128xf32>
    %3 = tpu.matmul %1, %2, %cst {dimension_numbers = #tpu.dot_dimension_numbers<[1], [0], [0], [1], [0, 0, 1, 1], [], []>} : vector<512x102xbf16>, vector<102x128xbf16>, vector<512x128xf32> -> vector<512x128xf32>
    %c0_3 = arith.constant 0 : index
    %c0_4 = arith.constant 0 : index
    %4 = vector.load %arg3[%c0_3, %c0_4] : memref<1x128xf32, #tpu.memory_space<vmem>>, vector<1x128xf32>
    %5 = vector.broadcast %4 : vector<1x128xf32> to vector<512x128xf32>
    %6 = arith.addf %3, %5 : vector<512x128xf32>
    %cst_5 = arith.constant 0.000000e+00 : f32
    %7 = vector.broadcast %cst_5 : f32 to vector<512x128xf32>
    %8 = arith.cmpf ogt, %6, %7 : vector<512x128xf32>
    %cst_6 = arith.constant 0.00999999977 : f32
    %9 = vector.broadcast %cst_6 : f32 to vector<512x128xf32>
    %10 = arith.mulf %9, %6 : vector<512x128xf32>
    %11 = arith.select %8, %6, %10 : vector<512x128xi1>, vector<512x128xf32>
    %12 = arith.truncf %11 : vector<512x128xf32> to vector<512x128xbf16>
    %c0_7 = arith.constant 0 : index
    %c0_8 = arith.constant 0 : index
    %13 = vector.load %arg4[%c0_7, %c0_8] : memref<128x64xbf16, #tpu.memory_space<vmem>>, vector<128x64xbf16>
    %cst_9 = arith.constant dense<0.000000e+00> : vector<512x64xf32>
    %14 = tpu.matmul %12, %13, %cst_9 {dimension_numbers = #tpu.dot_dimension_numbers<[1], [0], [0], [1], [0, 0, 1, 1], [], []>} : vector<512x128xbf16>, vector<128x64xbf16>, vector<512x64xf32> -> vector<512x64xf32>
    %c0_10 = arith.constant 0 : index
    %c0_11 = arith.constant 0 : index
    %15 = vector.load %arg5[%c0_10, %c0_11] : memref<1x64xf32, #tpu.memory_space<vmem>>, vector<1x64xf32>
    %16 = vector.broadcast %15 : vector<1x64xf32> to vector<512x64xf32>
    %17 = arith.addf %14, %16 : vector<512x64xf32>
    %cst_12 = arith.constant 0.000000e+00 : f32
    %18 = vector.broadcast %cst_12 : f32 to vector<512x64xf32>
    %19 = arith.cmpf ogt, %17, %18 : vector<512x64xf32>
    %cst_13 = arith.constant 0.00999999977 : f32
    %20 = vector.broadcast %cst_13 : f32 to vector<512x64xf32>
    %21 = arith.mulf %20, %17 : vector<512x64xf32>
    %22 = arith.select %19, %17, %21 : vector<512x64xi1>, vector<512x64xf32>
    %23 = arith.truncf %22 : vector<512x64xf32> to vector<512x64xbf16>
    %c0_14 = arith.constant 0 : index
    %c0_15 = arith.constant 0 : index
    %24 = vector.load %arg6[%c0_14, %c0_15] : memref<64x64xbf16, #tpu.memory_space<vmem>>, vector<64x64xbf16>
    %cst_16 = arith.constant dense<0.000000e+00> : vector<512x64xf32>
    %25 = tpu.matmul %23, %24, %cst_16 {dimension_numbers = #tpu.dot_dimension_numbers<[1], [0], [0], [1], [0, 0, 1, 1], [], []>} : vector<512x64xbf16>, vector<64x64xbf16>, vector<512x64xf32> -> vector<512x64xf32>
    %c0_17 = arith.constant 0 : index
    %c0_18 = arith.constant 0 : index
    %26 = vector.load %arg7[%c0_17, %c0_18] : memref<1x64xf32, #tpu.memory_space<vmem>>, vector<1x64xf32>
    %27 = vector.broadcast %26 : vector<1x64xf32> to vector<512x64xf32>
    %28 = arith.addf %25, %27 : vector<512x64xf32>
    %cst_19 = arith.constant 0.000000e+00 : f32
    %29 = vector.broadcast %cst_19 : f32 to vector<512x64xf32>
    %30 = arith.cmpf ogt, %28, %29 : vector<512x64xf32>
    %cst_20 = arith.constant 0.00999999977 : f32
    %31 = vector.broadcast %cst_20 : f32 to vector<512x64xf32>
    %32 = arith.mulf %31, %28 : vector<512x64xf32>
    %33 = arith.select %30, %28, %32 : vector<512x64xi1>, vector<512x64xf32>
    %c0_21 = arith.constant 0 : index
    %c0_22 = arith.constant 0 : index
    %34 = vector.load %arg8[%c0_21, %c0_22] : memref<8x64xbf16, #tpu.memory_space<vmem>>, vector<8x64xbf16>
    %35 = arith.truncf %33 : vector<512x64xf32> to vector<512x64xbf16>
    %cst_23 = arith.constant dense<0.000000e+00> : vector<8x512xf32>
    %36 = tpu.matmul %34, %35, %cst_23 {dimension_numbers = #tpu.dot_dimension_numbers<[1], [1], [0], [0], [0, 0, 1, 0], [], []>} : vector<8x64xbf16>, vector<512x64xbf16>, vector<8x512xf32> -> vector<8x512xf32>
    %37 = vector.extract_strided_slice %36 {offsets = [0, 0], sizes = [1, 512], strides = [1, 1]} : vector<8x512xf32> to vector<1x512xf32>
    %c0_24 = arith.constant 0 : index
    %c0_25 = arith.constant 0 : index
    %38 = vector.load %arg9[%c0_24, %c0_25] : memref<1x1xf32, #tpu.memory_space<vmem>>, vector<1x1xf32>
    %39 = vector.broadcast %38 : vector<1x1xf32> to vector<1x512xf32>
    %40 = arith.addf %37, %39 : vector<1x512xf32>
    %c0_26 = arith.constant 0 : index
    %c0_27 = arith.constant 0 : index
    %41 = vector.load %arg10[%c0_26, %c0_27] : memref<1x512xf32, #tpu.memory_space<vmem>>, vector<1x512xf32>
    tpu.vector_store %arg10[%c0_26, %c0_27], %40 {strides = array<i32>} : memref<1x512xf32, #tpu.memory_space<vmem>>, vector<1x512xf32>,
    return
  }
  func.func @transform_0(%arg0: i32) -> (i32, i32) {
    %c0_i32 = arith.constant 0 : i32
    %c0_i32_0 = arith.constant 0 : i32
    return %arg0, %c0_i32 : i32, i32
  }
  func.func @transform_1(%arg0: i32) -> (i32, i32) {
    %c0_i32 = arith.constant 0 : i32
    %c0_i32_0 = arith.constant 0 : i32
    %c0_i32_1 = arith.constant 0 : i32
    return %c0_i32, %c0_i32_0 : i32, i32
  }
  func.func @transform_2(%arg0: i32) -> (i32, i32) {
    %c0_i32 = arith.constant 0 : i32
    %c0_i32_0 = arith.constant 0 : i32
    %c0_i32_1 = arith.constant 0 : i32
    return %c0_i32, %c0_i32_0 : i32, i32
  }
  func.func @transform_3(%arg0: i32) -> (i32, i32) {
    %c0_i32 = arith.constant 0 : i32
    %c0_i32_0 = arith.constant 0 : i32
    %c0_i32_1 = arith.constant 0 : i32
    return %c0_i32, %c0_i32_0 : i32, i32
  }
  func.func @transform_4(%arg0: i32) -> (i32, i32) {
    %c0_i32 = arith.constant 0 : i32
    %c0_i32_0 = arith.constant 0 : i32
    %c0_i32_1 = arith.constant 0 : i32
    return %c0_i32, %c0_i32_0 : i32, i32
  }
  func.func @transform_5(%arg0: i32) -> (i32, i32) {
    %c0_i32 = arith.constant 0 : i32
    %c0_i32_0 = arith.constant 0 : i32
    %c0_i32_1 = arith.constant 0 : i32
    return %c0_i32, %c0_i32_0 : i32, i32
  }
  func.func @transform_6(%arg0: i32) -> (i32, i32) {
    %c0_i32 = arith.constant 0 : i32
    %c0_i32_0 = arith.constant 0 : i32
    %c0_i32_1 = arith.constant 0 : i32
    return %c0_i32, %c0_i32_0 : i32, i32
  }
  func.func @transform_7(%arg0: i32) -> (i32, i32) {
    %c0_i32 = arith.constant 0 : i32
    %c0_i32_0 = arith.constant 0 : i32
    %c0_i32_1 = arith.constant 0 : i32
    return %c0_i32, %c0_i32_0 : i32, i32
  }
  func.func @transform_8(%arg0: i32) -> (i32, i32) {
    %c0_i32 = arith.constant 0 : i32
    %c0_i32_0 = arith.constant 0 : i32
    %c0_i32_1 = arith.constant 0 : i32
    return %c0_i32, %c0_i32_0 : i32, i32
  }
  func.func @transform_9(%arg0: i32) -> (i32, i32) {
    %c0_i32 = arith.constant 0 : i32
    %c0_i32_0 = arith.constant 0 : i32
    return %c0_i32, %arg0 : i32, i32
  }
}

</mosaic_0001>

<bundles_post_ra>
// kernel: tpu_custom_call.1
= control target key start
LH: loop header
LB: loop body
LE: loop exit
PB: predicated region body
PF: predicated region fallthrough
CT: control target
= control target key end

     0   :  { %s4032_s0 = inlined_call_operand.vmem [shape: f32[1024,102], index: 0, kind: input, shape index: {}]   ;;  %s4033_s1 = inlined_call_operand.vmem [shape: bf16[102,128], index: 1, kind: input, shape index: {}]   ;;  %s4034_s2 = inlined_call_operand.vmem [shape: f32[1,128], index: 2, kind: input, shape index: {}]   ;;  %s4035_s3 = inlined_call_operand.vmem [shape: bf16[128,64], index: 3, kind: input, shape index: {}]   ;;  %s4036_s4 = inlined_call_operand.vmem [shape: f32[1,64], index: 4, kind: input, shape index: {}]   ;;  %s4037_s5 = inlined_call_operand.vmem [shape: bf16[64,64], index: 5, kind: input, shape index: {}]   ;;  %s4038_s6 = inlined_call_operand.vmem [shape: f32[1,64], index: 6, kind: input, shape index: {}]   ;;  %s4039_s7 = inlined_call_operand.vmem [shape: bf16[8,64], index: 7, kind: input, shape index: {}]   ;;  %s4040_s8 = inlined_call_operand.<no memory space> [shape: f32[1,1], index: 8, kind: input, shape index: {}]   ;;  %s4041_s9 = inlined_call_operand.hbm [shape: f32[1,1024], index: 9, kind: output, shape index: {}]  }
   0x1   :  { %v14_v0 = vstv %s4040_s8 }
   0x2   :  { %15 = vst [vmem:[#allocation2] sm:$0x1] %v14_v0 }
   0x3   :  { %16 = vsyncpa [#allocation4], 0 }
   0x4   :  { %18 = vsyncpa [#allocation4 + $0x1], 0  ;;  %s3323_s11 = smov 0   ;;  %s3325_s12 = smov 0  }
   0x5   :  { %s3327_s13 = smov 0   ;;  %s3329_s14 = smov 0  }
   0x6 LB: > { %s2642_s8 = sadd.s32 4294967295, %s3265_s14   ;;  %s2643_s15 = sadd.s32 4294967294, %s3265_s14   ;;  %s3265_s14 = sphi %s3329_s14, %s4047_s14   ;;  %s3261_s13 = sphi %s3327_s13, %s4046_s13   ;;  %s3257_s12 = sphi %s3325_s12, %s4045_s12   ;;  %s3253_s11 = sphi %s3323_s11, %s4044_s11  }
   0x7   : > { %s3346_s16 = sadd.s32 1, %s3265_s14   ;;  %s225_s17 = sadd.s32 1, %s3261_s13 }
   0x8   : > { %s222_s18 = ssub.s32 %s3265_s14, %s3346_s16  ;;  %p235_p0 = scmp.ne.s32.totalorder %s3261_s13, %s3257_s12 }
   0x9   : > { %p223_p1 = scmp.eq.s32.totalorder %s222_s18, 0  ;;  %p236_p2 = scmp.eq.s32.totalorder %s2642_s8, 1 }
   0xa   : > { %p241_p3 = scmp.ne.s32.totalorder %s3257_s12, %s3253_s11  ;;  %p242_p4 = scmp.eq.s32.totalorder %s2643_s15, 1 }
   0xb   : > { %s3356_s19 = scalar_select %p223_p1, %s3261_s13, %s225_s17  }
   0xc   : > { %p3358_p5 = por %p236_p2, %p235_p0  ;;  %p3362_p6 = por %p242_p4, %p241_p3 }
   0xd   : > { %p2646_p7 = scmp.ge.s32.totalorder %s3265_s14, 1  ;;  %p293_p8 = scmp.lt.s32.totalorder %s3265_s14, 3 }
   0xf   : > { %p294_p9 = pnand %p2646_p7, %p293_p8 }
  0x10   : > { %v3184_v1 = vld [vmem:[%s4033_s1] sm:$0xff] (!%p294_p9)   ;;  %v3185_v2 = vld [vmem:[%s4033_s1 + $0x8] sm:$0xff] (!%p294_p9)   ;;  %s3374_s26 = sshll.u32 (!%p294_p9), %s2642_s8, 6  ;;  %v3186_v3 = vld [vmem:[%s4033_s1 + $0x10] sm:$0xff] (!%p294_p9)   ;;  %vm492_vm0 = vcmask (!%p294_p9), 834560   ;;  %vm589_vm1 = vcmask (!%p294_p9), 1042432  }
  0x11   : > { %297 = sbr.rel (%p294_p9) target bundleno = 1110 (0x456), region = 56  ;;  %2895 = vmatprep.subr.bf16.mxu0 (!%p294_p9), %v3184_v1  ;;  %p330_p10 = scmp.lt.s32.totalorder (!%p294_p9), %s3374_s26, 127  ;;  %v3187_v4 = vld [vmem:[%s4033_s1 + $0x18] sm:$0xff] (!%p294_p9)   ;;  %v3188_v8 = vld [vmem:[%s4033_s1 + $0x20] sm:$0xff] (!%p294_p9)   ;;  %v3189_v9 = vld [vmem:[%s4033_s1 + $0x28] sm:$0xff] (!%p294_p9)  }
  0x12   : > { %2896 = vmatpush3.bf16.msra.mxu0 (!%p294_p9), %v3184_v1  ;;  %v3190_v10 = vld [vmem:[%s4033_s1 + $0x30] ss:$0 sps:$4 sm:$0x77] (!%p294_p9)   ;;  %v3191_v20 = vld [vmem:[%s4035_s3] sm:$0xff] (!%p294_p9)   ;;  %v3192_v21 = vld [vmem:[%s4035_s3 + $0x8] sm:$0xff] (!%p294_p9)   ;;  %s326_s22 = sand.u32 (!%p294_p9), 1, %s3257_s12  }
  0x13   : > { %2897 = vmatprep.subr.bf16.mxu0 (!%p294_p9), %v3185_v2  ;;  %v591_v13 = vsel (!%p294_p9), %vm589_vm1, %v3190_v10, 0  ;;  %2973 = vmatprep.subr.bf16.mxu1 (!%p294_p9), %v3191_v20  ;;  %v3193_v24 = vld [vmem:[%s4035_s3 + $0x10] sm:$0xff] (!%p294_p9)   ;;  %v3194_v27 = vld [vmem:[%s4035_s3 + $0x18] sm:$0xff] (!%p294_p9)   ;;  %v3195_v32 = vld [vmem:[%s4035_s3 + $0x20] sm:$0xff] (!%p294_p9)   ;;  %s2647_s23 = sshll.u32 (!%p294_p9), %s326_s22, 2  ;;  %s3269_s15 = smov (!%p294_p9), [#allocation3]  }
  0x14   : > { %2974 = vmatpush3.bf16.msra.mxu1 (!%p294_p9), %v3191_v20  ;;  %s328_s24 = scalar_lea.vmem (!%p294_p9), [#allocation3], %s2647_s23  ;;  %s3207_s8 = sshll.u32 (!%p294_p9), %s3269_s15, 4  ;;  %s3208_s8 = int_to_ptr.vmem [resolvable:$false] %s3207_s8 }
  0x15   : > { %2975 = vmatprep.subr.bf16.mxu1 (!%p294_p9), %v3192_v21  ;;  %s2584_s25 = sshll.u32 (!%p294_p9), %s328_s24, 4  ;;  %s3209_s18 = scalar_lea.vmem (!%p294_p9), %s3208_s8, 128  ;;  %s3992_s25 = int_to_ptr.vmem [resolvable:$true] %s2584_s25 }
  0x16   : > { %2898 = vmatpush3.bf16.msra.mxu0 (!%p294_p9), %v3185_v2  ;;  %s3203_s10 = scalar_lea.vmem (!%p294_p9), %s3992_s25, 64  ;;  %p3210_p0 = scmp.lt.s32.totalorder (!%p294_p9), %s3992_s25, %s3208_s8 }
  0x17   : > { %2899 = vmatprep.subr.bf16.mxu0 (!%p294_p9), %v3186_v3  ;;  %p3204_p11 = scmp.ne.s32.totalorder (!%p294_p9), %s3992_s25, %s3203_s10  ;;  %p3211_p1 = scmp.lt.s32.totalorder (!%p294_p9), %s3209_s18, %s3203_s10 }
  0x18   : > { %s331_s29 = scalar_select %p330_p10, %s3374_s26, 127  ;;  %2976 = vmatpush3.bf16.msra.mxu1 %v3192_v21  ;;  %v3196_v21 = vld [vmem:[%s4035_s3 + $0x28] sm:$0xff]  }
  0x19   : > { %2977 = vmatprep.subr.bf16.mxu1 %v3193_v24  ;;  %p3205_p12 = pnand %p3204_p11, %p3358_p5  ;;  %p3212_p2 = por %p3211_p1, %p3210_p0 }
  0x1a   : > { %s2649_s30 = sshll.u32 %s331_s29, 3  ;;  %2900 = vmatpush3.bf16.msra.mxu0 %v3186_v3  ;;  %s3990_s29 = scalar_lea.hbm %s4041_s9, %s3374_s26 }
  0x1b   : > { %s3384_s17 = scalar_lea.vmem %s4032_s0, %s2649_s30  ;;  %2901 = vmatprep.subr.bf16.mxu0 %v3187_v4  ;;  %s2570_s30 = scalar_lea.sflag [#allocation4], %s326_s22 }
  0x1c   : > { %v337_v5 = vld [vmem:[%s3384_s17] sm:$0xff]  ;;  %v338_v6 = vld [vmem:[%s3384_s17 + $0x8] sm:$0xff]  ;;  %v339_v11 = vld [vmem:[%s3384_s17 + $0x10] sm:$0xff]  ;;  %2978 = vmatpush3.bf16.msra.mxu1 %v3193_v24  ;;  %p3206_p13 = pneg %p3205_p12 }
  0x1d   : > { %v401_v7 = vpack.c.bf16 %v338_v6, %v337_v5  ;;  %v340_v12 = vld [vmem:[%s3384_s17 + $0x18] sm:$0xff]  ;;  %v341_v14 = vld [vmem:[%s3384_s17 + $0x20] sm:$0xff]  ;;  %v342_v15 = vld [vmem:[%s3384_s17 + $0x28] sm:$0xff]  ;;  %2979 = vmatprep.subr.bf16.mxu1 %v3194_v27 }
  0x1e   : > { %2902 = vmatpush3.bf16.msra.mxu0 %v3187_v4  ;;  %v402_v16 = vpack.c.bf16 %v340_v12, %v339_v11  ;;  %v403_v17 = vpack.c.bf16 %v342_v15, %v341_v14  ;;  %v343_v18 = vld [vmem:[%s3384_s17 + $0x30] sm:$0xff]  ;;  %v344_v19 = vld [vmem:[%s3384_s17 + $0x38] sm:$0xff]  ;;  %v345_v22 = vld [vmem:[%s3384_s17 + $0x40] sm:$0xff]  ;;  %p3213_p3 = pnand %p3212_p2, %p3206_p13 }
  0x1f   : > { %2909 = vmatprep.mubr.msk.bf16.mxu0 %vm492_vm0, %v401_v7  ;;  %2903 = vmatprep.subr.bf16.mxu0 %v3188_v8  ;;  %v346_v23 = vld [vmem:[%s3384_s17 + $0x48] sm:$0xff]  ;;  %v404_v25 = vpack.c.bf16 %v344_v19, %v343_v18  ;;  %v347_v28 = vld [vmem:[%s3384_s17 + $0x50] sm:$0xff]  ;;  %v348_v29 = vld [vmem:[%s3384_s17 + $0x58] sm:$0xff] }
  0x20   : > { %v405_v26 = vpack.c.bf16 %v346_v23, %v345_v22  ;;  %v349_v30 = vld [vmem:[%s3384_s17 + $0x60] sm:$0xff]  ;;  %v350_v31 = vld [vmem:[%s3384_s17 + $0x68] sm:$0xff]  ;;  %v406_v33 = vpack.c.bf16 %v348_v29, %v347_v28  ;;  %2980 = vmatpush3.bf16.msra.mxu1 %v3194_v27  ;;  %v351_v35 = vld [vmem:[%s3384_s17 + $0x70] sm:$0xff] }
  0x21   : > { %v407_v34 = vpack.c.bf16 %v350_v31, %v349_v30  ;;  %2981 = vmatprep.subr.bf16.mxu1 %v3195_v32  ;;  %v352_v36 = vld [vmem:[%s3384_s17 + $0x78] sm:$0xff]  ;;  %v353_v37 = vld [vmem:[%s3384_s17 + $0x80] sm:$0xff]  ;;  %v354_v38 = vld [vmem:[%s3384_s17 + $0x88] sm:$0xff] }
  0x22   : > { %2904 = vmatpush3.bf16.msra.mxu0 %v3188_v8  ;;  %v408_v39 = vpack.c.bf16 %v352_v36, %v351_v35  ;;  %v409_v40 = vpack.c.bf16 %v354_v38, %v353_v37  ;;  %v355_v41 = vld [vmem:[%s3384_s17 + $0x90] sm:$0xff]  ;;  %v356_v42 = vld [vmem:[%s3384_s17 + $0x98] sm:$0xff]  ;;  %v357_v43 = vld [vmem:[%s3384_s17 + $0xa0] sm:$0xff] }
  0x23   : > { %2905 = vmatprep.subr.bf16.mxu0 %v3189_v9  ;;  %v358_v44 = vld [vmem:[%s3384_s17 + $0xa8] sm:$0xff]  ;;  %v410_v45 = vpack.c.bf16 %v356_v42, %v355_v41  ;;  %v359_v47 = vld [vmem:[%s3384_s17 + $0xb0] sm:$0xff]  ;;  %v360_v48 = vld [vmem:[%s3384_s17 + $0xb8] sm:$0xff] }
  0x24   : > { %2982 = vmatpush3.bf16.msra.mxu1 %v3195_v32  ;;  %v411_v46 = vpack.c.bf16 %v358_v44, %v357_v43  ;;  %v361_v49 = vld [vmem:[%s3384_s17 + $0xc0] sm:$0xff]  ;;  %v362_v50 = vld [vmem:[%s3384_s17 + $0xc8] sm:$0xff]  ;;  %v412_v51 = vpack.c.bf16 %v360_v48, %v359_v47  ;;  %v363_v53 = vld [vmem:[%s3384_s17 + $0xd0] sm:$0xff] }
  0x25   : > { %v413_v52 = vpack.c.bf16 %v362_v50, %v361_v49  ;;  %v364_v54 = vld [vmem:[%s3384_s17 + $0xd8] sm:$0xff]  ;;  %v365_v55 = vld [vmem:[%s3384_s17 + $0xe0] sm:$0xff]  ;;  %v366_v56 = vld [vmem:[%s3384_s17 + $0xe8] sm:$0xff]  ;;  %2983 = vmatprep.subr.bf16.mxu1 %v3196_v21 }
  0x26   : > { %2906 = vmatpush3.bf16.msra.mxu0 %v3189_v9  ;;  %v414_v57 = vpack.c.bf16 %v364_v54, %v363_v53  ;;  %v415_v58 = vpack.c.bf16 %v366_v56, %v365_v55  ;;  %v367_v59 = vld [vmem:[%s3384_s17 + $0xf0] sm:$0xff]  ;;  %v368_v60 = vld [vmem:[%s3384_s17 + $0xf8] sm:$0xff]  ;;  %v369_v61 = vld [vmem:[%s3384_s17 + $0x100] sm:$0xff] }
  0x27   : > { %3125 = vmatprep.subr.msk.bf16.mxu0 %vm589_vm1, %v3190_v10  ;;  %v370_v62 = vld [vmem:[%s3384_s17 + $0x108] sm:$0xff]  ;;  %v416_v63 = vpack.c.bf16 %v368_v60, %v367_v59  ;;  %v371_v1 = vld [vmem:[%s3384_s17 + $0x110] sm:$0xff]  ;;  %v372_v2 = vld [vmem:[%s3384_s17 + $0x118] sm:$0xff] }
  0x28   : > { %v417_v0 = vpack.c.bf16 %v370_v62, %v369_v61  ;;  %v373_v3 = vld [vmem:[%s3384_s17 + $0x120] sm:$0xff]  ;;  %v374_v4 = vld [vmem:[%s3384_s17 + $0x128] sm:$0xff]  ;;  %v418_v5 = vpack.c.bf16 %v372_v2, %v371_v1  ;;  %v375_v7 = vld [vmem:[%s3384_s17 + $0x130] sm:$0xff]  ;;  %2984 = vmatpush3.bf16.msra.mxu1 %v3196_v21 }
  0x29   : > { %v419_v6 = vpack.c.bf16 %v374_v4, %v373_v3  ;;  %v376_v8 = vld [vmem:[%s3384_s17 + $0x138] sm:$0xff]  ;;  %v377_v9 = vld [vmem:[%s3384_s17 + $0x140] sm:$0xff]  ;;  %v378_v10 = vld [vmem:[%s3384_s17 + $0x148] sm:$0xff] }
  0x2a   : > { %2908 = vmatpush3.bf16.msra.mxu0 %v591_v13  ;;  %v420_v11 = vpack.c.bf16 %v376_v8, %v375_v7  ;;  %v421_v12 = vpack.c.bf16 %v378_v10, %v377_v9  ;;  %v379_v13 = vld [vmem:[%s3384_s17 + $0x150] sm:$0xff]  ;;  %v380_v14 = vld [vmem:[%s3384_s17 + $0x158] sm:$0xff]  ;;  %v381_v15 = vld [vmem:[%s3384_s17 + $0x160] sm:$0xff] }
  0x2b   : > { %v383_v19 = vld [vmem:[%s3384_s17 + $0x170] sm:$0xff]  ;;  %v384_v20 = vld [vmem:[%s3384_s17 + $0x178] sm:$0xff]  ;;  %v385_v22 = vld [vmem:[%s3384_s17 + $0x180] sm:$0xff] }
  0x2c   : > { %v386_v23 = vld [vmem:[%s3384_s17 + $0x188] sm:$0xff]  ;;  %v424_v24 = vpack.c.bf16 %v384_v20, %v383_v19  ;;  %v387_v27 = vld [vmem:[%s3384_s17 + $0x190] sm:$0xff]  ;;  %v388_v28 = vld [vmem:[%s3384_s17 + $0x198] sm:$0xff] }
  0x2d   : > { %2910 = vmatmul.mubr.msk.bf16.vlgmr.msra.gmra.mrb[0].mxu0 %vm492_vm0, %v402_v16  ;;  %v382_v16 = vld [vmem:[%s3384_s17 + $0x168] sm:$0xff]  ;;  %v3198_v29 = vld [vmem:[%s4035_s3 + $0x38] sm:$0xff]   ;;  %v389_v30 = vld [vmem:[%s3384_s17 + $0x1a0] sm:$0xff]  ;;  %v426_v32 = vpack.c.bf16 %v388_v28, %v387_v27 }
  0x2e   : > { %2913 = vmatprep.mubr.msk.bf16.mxu0 %vm492_vm0, %v403_v17  ;;  %v422_v17 = vpack.c.bf16 %v380_v14, %v379_v13  ;;  %v423_v18 = vpack.c.bf16 %v382_v16, %v381_v15  ;;  %v390_v31 = vld [vmem:[%s3384_s17 + $0x1a8] sm:$0xff]  ;;  %v392_v35 = vld [vmem:[%s3384_s17 + $0x1b8] sm:$0xff]  ;;  %v393_v36 = vld [vmem:[%s3384_s17 + $0x1c0] sm:$0xff] }
  0x2f   : > { %v394_v37 = vld [vmem:[%s3384_s17 + $0x1c8] sm:$0xff]  ;;  %v396_v41 = vld [vmem:[%s3384_s17 + $0x1d8] sm:$0xff]  ;;  %v397_v42 = vld [vmem:[%s3384_s17 + $0x1e0] sm:$0xff] }
  0x30   : > { %v398_v43 = vld [vmem:[%s3384_s17 + $0x1e8] sm:$0xff]  ;;  %v400_v47 = vld [vmem:[%s3384_s17 + $0x1f8] sm:$0xff]  ;;  %v3521_v49 = vld [vmem:[%s4034_s2] ss:$0 sm:$0xff] }
  0x31   : > { %v3199_v60 = vld [vmem:[%s4037_s5] sm:$0xff]   ;;  %v3200_v61 = vld [vmem:[%s4037_s5 + $0x8] sm:$0xff]  }
  0x32   : > { %3053 = vmatprep.subr.bf16.mxu0 %v3199_v60 }
  0x33   : > { %3054 = vmatpush3.bf16.msra.mxu0 %v3199_v60 }
  0x34   : > { %3055 = vmatprep.subr.bf16.mxu0 %v3200_v61 }
  0x35   : > { %2914 = vmatmul.mubr.msk.bf16.gmra.mrb[4].mxu0 %vm492_vm0, %v404_v25  ;;  %v425_v25 = vpack.c.bf16 %v386_v23, %v385_v22 }
  0x36   : > { %2917 = vmatprep.mubr.msk.bf16.mxu0 %vm492_vm0, %v405_v26  ;;  %v3197_v26 = vld [vmem:[%s4035_s3 + $0x30] sm:$0xff]  }
  0x37   : > { %2985 = vmatprep.subr.bf16.mxu1 %v3197_v26  ;;  %3056 = vmatpush3.bf16.msra.mxu0 %v3200_v61 }
  0x38   : > { %2986 = vmatpush3.bf16.msra.mxu1 %v3197_v26 }
  0x39   : > { %2987 = vmatprep.subr.bf16.mxu1 %v3198_v29 }
  0x3c   : > { %2988 = vmatpush3.bf16.msra.mxu1 %v3198_v29 }
  0x3d   : > { %2918 = vmatmul.mubr.msk.bf16.gmra.mrb[8].mxu0 %vm492_vm0, %v406_v33  ;;  %v427_v33 = vpack.c.bf16 %v390_v31, %v389_v30 }
  0x3e   : > { %2921 = vmatprep.mubr.msk.bf16.mxu0 %vm492_vm0, %v407_v34  ;;  %v391_v34 = vld [vmem:[%s3384_s17 + $0x1b0] sm:$0xff] }
  0x3f   : > { %v428_v38 = vpack.c.bf16 %v392_v35, %v391_v34 }
  0x45   : > { %2922 = vmatmul.mubr.msk.bf16.gmra.mrb[12].mxu0 %vm492_vm0, %v408_v39  ;;  %v429_v39 = vpack.c.bf16 %v394_v37, %v393_v36 }
  0x46   : > { %2925 = vmatprep.mubr.msk.bf16.mxu0 %vm492_vm0, %v409_v40  ;;  %v395_v40 = vld [vmem:[%s3384_s17 + $0x1d0] sm:$0xff] }
  0x47   : > { %v430_v44 = vpack.c.bf16 %v396_v41, %v395_v40 }
  0x4d   : > { %2926 = vmatmul.mubr.msk.bf16.gmra.mrb[16].mxu0 %vm492_vm0, %v410_v45  ;;  %v431_v45 = vpack.c.bf16 %v398_v43, %v397_v42 }
  0x4e   : > { %2929 = vmatprep.mubr.msk.bf16.mxu0 %vm492_vm0, %v411_v46  ;;  %v399_v46 = vld [vmem:[%s3384_s17 + $0x1f0] sm:$0xff] }
  0x4f   : > { %v432_v48 = vpack.c.bf16 %v400_v47, %v399_v46 }
  0x55   : > { %2930 = vmatmul.mubr.msk.bf16.gmra.mrb[20].mxu0 %vm492_vm0, %v412_v51 }
  0x56   : > { %2933 = vmatprep.mubr.msk.bf16.mxu0 %vm492_vm0, %v413_v52 }
  0x5d   : > { %2934 = vmatmul.mubr.msk.bf16.gmra.mrb[24].mxu0 %vm492_vm0, %v414_v57 }
  0x5e   : > { %2937 = vmatprep.mubr.msk.bf16.mxu0 %vm492_vm0, %v415_v58 }
  0x65   : > { %2938 = vmatmul.mubr.msk.bf16.gmra.mrb[28].mxu0 %vm492_vm0, %v416_v63 }
  0x66   : > { %2941 = vmatprep.mubr.msk.bf16.mxu0 %vm492_vm0, %v417_v0 }
  0x6d   : > { %2942 = vmatmul.mubr.msk.bf16.gmra.mrb[32].mxu0 %vm492_vm0, %v418_v5 }
  0x6e   : > { %2945 = vmatprep.mubr.msk.bf16.mxu0 %vm492_vm0, %v419_v6 }
  0x75   : > { %2946 = vmatmul.mubr.msk.bf16.gmra.mrb[36].mxu0 %vm492_vm0, %v420_v11 }
  0x76   : > { %2949 = vmatprep.mubr.msk.bf16.mxu0 %vm492_vm0, %v421_v12 }
  0x7d   : > { %2950 = vmatmul.mubr.msk.bf16.gmra.mrb[40].mxu0 %vm492_vm0, %v422_v17 }
  0x7e   : > { %2953 = vmatprep.mubr.msk.bf16.mxu0 %vm492_vm0, %v423_v18 }
  0x85   : > { %2954 = vmatmul.mubr.msk.bf16.gmra.mrb[44].mxu0 %vm492_vm0, %v424_v24 }
  0x86   : > { %2957 = vmatprep.mubr.msk.bf16.mxu0 %vm492_vm0, %v425_v25 }
  0x8d   : > { %2958 = vmatmul.mubr.msk.bf16.gmra.mrb[48].mxu0 %vm492_vm0, %v426_v32 }
  0x8e   : > { %2961 = vmatprep.mubr.msk.bf16.mxu0 %vm492_vm0, %v427_v33 }
  0x95   : > { %2962 = vmatmul.mubr.msk.bf16.gmra.mrb[52].mxu0 %vm492_vm0, %v428_v38 }
  0x96   : > { %2965 = vmatprep.mubr.msk.bf16.mxu0 %vm492_vm0, %v429_v39 }
  0x9d   : > { %2966 = vmatmul.mubr.msk.bf16.gmra.mrb[56].mxu0 %vm492_vm0, %v430_v44 }
  0x9e   : > { %2969 = vmatprep.mubr.msk.bf16.mxu0 %vm492_vm0, %v431_v45 }
  0xa5   : > { %2970 = vmatmul.mubr.msk.bf16.gmra.mrb[60].mxu0 %vm492_vm0, %v432_v48 }
 0x100   : > { %v2911_v50 = vpop.f32.mrb[0].mxu0 }
 0x101   : > { %v636_v51 = vadd.f32 %v2911_v50, %v3521_v49  ;;  %v627_v52 = vpop.f32.mrb[1].mxu0 }
 0x102   : > { %v628_v53 = vadd.f32 %v3521_v49, %v627_v52  ;;  %v2912_v54 = vpop.f32.mrb[2].mxu0 }
 0x103   : > { %v948_v55 = vmul.f32 0.01, %v636_v51  ;;  %v639_v56 = vadd.f32 %v2912_v54, %v3521_v49  ;;  %v630_v57 = vpop.f32.mrb[3].mxu0  ;;  %vm884_vm2 = vcmp.gt.f32.partialorder %v636_v51, 0.0 }
 0x104   : > { %v946_v58 = vmul.f32 0.01, %v628_v53  ;;  %v631_v59 = vadd.f32 %v3521_v49, %v630_v57  ;;  %vm882_vm4 = vcmp.gt.f32.partialorder %v628_v53, 0.0 }
 0x105   : > { %vm885_vm3 = vcmp.gt.f32.partialorder %v639_v56, 0.0  ;;  %v949_v62 = vmul.f32 0.01, %v639_v56  ;;  %v1012_v0 = vsel %vm884_vm2, %v636_v51, %v948_v55 }
 0x106   : > { %v947_v63 = vmul.f32 0.01, %v631_v59  ;;  %vm883_vm5 = vcmp.gt.f32.partialorder %v631_v59, 0.0  ;;  %v1010_v3 = vsel %vm882_vm4, %v628_v53, %v946_v58 }
 0x107   : > { %v1013_v1 = vsel %vm885_vm3, %v639_v56, %v949_v62 }
 0x108   : > { %v2915_v2 = vpop.f32.mrb[4].mxu0  ;;  %v1011_v4 = vsel %vm883_vm5, %v631_v59, %v947_v63  ;;  %v1075_v5 = vpack.c.bf16 %v1013_v1, %v1012_v0 }
 0x109   : > { %v652_v6 = vadd.f32 %v2915_v2, %v3521_v49  ;;  %v643_v7 = vpop.f32.mrb[5].mxu0  ;;  %v1074_v8 = vpack.c.bf16 %v1011_v4, %v1010_v3 }
 0x10a   : > { %v644_v9 = vadd.f32 %v3521_v49, %v643_v7  ;;  %v2916_v10 = vpop.f32.mrb[6].mxu0 }
 0x10b   : > { %v952_v11 = vmul.f32 0.01, %v652_v6  ;;  %v655_v12 = vadd.f32 %v2916_v10, %v3521_v49  ;;  %v646_v13 = vpop.f32.mrb[7].mxu0  ;;  %2989 = vmatprep.mubr.bf16.mxu1 %v1074_v8  ;;  %vm888_vm6 = vcmp.gt.f32.partialorder %v652_v6, 0.0 }
 0x10c   : > { %v950_v14 = vmul.f32 0.01, %v644_v9  ;;  %v647_v15 = vadd.f32 %v3521_v49, %v646_v13  ;;  %2990 = vmatmul.mubr.bf16.vlgmr.msra.gmra.mrb[0].mxu1 %v1075_v5  ;;  %vm886_vm7 = vcmp.gt.f32.partialorder %v644_v9, 0.0 }
 0x10d   : > { %vm889_vm8 = vcmp.gt.f32.partialorder %v655_v12, 0.0  ;;  %v953_v16 = vmul.f32 0.01, %v655_v12  ;;  %v1016_v18 = vsel %vm888_vm6, %v652_v6, %v952_v11 }
 0x10e   : > { %vm887_vm9 = vcmp.gt.f32.partialorder %v647_v15, 0.0  ;;  %v951_v17 = vmul.f32 0.01, %v647_v15  ;;  %v1014_v21 = vsel %vm886_vm7, %v644_v9, %v950_v14 }
 0x10f   : > { %v1017_v19 = vsel %vm889_vm8, %v655_v12, %v953_v16 }
 0x110   : > { %v2919_v20 = vpop.f32.mrb[8].mxu0  ;;  %v1015_v22 = vsel %vm887_vm9, %v647_v15, %v951_v17  ;;  %v1077_v23 = vpack.c.bf16 %v1017_v19, %v1016_v18 }
 0x111   : > { %v668_v24 = vadd.f32 %v2919_v20, %v3521_v49  ;;  %v659_v25 = vpop.f32.mrb[9].mxu0  ;;  %v1076_v26 = vpack.c.bf16 %v1015_v22, %v1014_v21 }
 0x112   : > { %v660_v27 = vadd.f32 %v3521_v49, %v659_v25  ;;  %v2920_v28 = vpop.f32.mrb[10].mxu0 }
 0x113   : > { %v956_v29 = vmul.f32 0.01, %v668_v24  ;;  %v671_v30 = vadd.f32 %v2920_v28, %v3521_v49  ;;  %v662_v31 = vpop.f32.mrb[11].mxu0  ;;  %2993 = vmatprep.mubr.bf16.mxu1 %v1076_v26  ;;  %vm892_vm10 = vcmp.gt.f32.partialorder %v668_v24, 0.0 }
 0x114   : > { %v954_v32 = vmul.f32 0.01, %v660_v27  ;;  %v663_v33 = vadd.f32 %v3521_v49, %v662_v31  ;;  %2994 = vmatmul.mubr.bf16.gmra.mrb[4].mxu1 %v1077_v23  ;;  %vm890_vm11 = vcmp.gt.f32.partialorder %v660_v27, 0.0 }
 0x115   : > { %vm893_vm12 = vcmp.gt.f32.partialorder %v671_v30, 0.0  ;;  %v957_v34 = vmul.f32 0.01, %v671_v30  ;;  %v1020_v36 = vsel %vm892_vm10, %v668_v24, %v956_v29 }
 0x116   : > { %vm891_vm13 = vcmp.gt.f32.partialorder %v663_v33, 0.0  ;;  %v955_v35 = vmul.f32 0.01, %v663_v33  ;;  %v1018_v39 = vsel %vm890_vm11, %v660_v27, %v954_v32 }
 0x117   : > { %v1021_v37 = vsel %vm893_vm12, %v671_v30, %v957_v34 }
 0x118   : > { %v2923_v38 = vpop.f32.mrb[12].mxu0  ;;  %v1019_v40 = vsel %vm891_vm13, %v663_v33, %v955_v35  ;;  %v1079_v41 = vpack.c.bf16 %v1021_v37, %v1020_v36 }
 0x119   : > { %v684_v42 = vadd.f32 %v2923_v38, %v3521_v49  ;;  %v675_v43 = vpop.f32.mrb[13].mxu0  ;;  %v1078_v44 = vpack.c.bf16 %v1019_v40, %v1018_v39 }
 0x11a   : > { %v676_v45 = vadd.f32 %v3521_v49, %v675_v43  ;;  %v2924_v46 = vpop.f32.mrb[14].mxu0 }
 0x11b   : > { %v960_v47 = vmul.f32 0.01, %v684_v42  ;;  %v687_v48 = vadd.f32 %v2924_v46, %v3521_v49  ;;  %v678_v50 = vpop.f32.mrb[15].mxu0  ;;  %2997 = vmatprep.mubr.bf16.mxu1 %v1078_v44  ;;  %vm896_vm14 = vcmp.gt.f32.partialorder %v684_v42, 0.0 }
 0x11c   : > { %v958_v51 = vmul.f32 0.01, %v676_v45  ;;  %v679_v52 = vadd.f32 %v3521_v49, %v678_v50  ;;  %2998 = vmatmul.mubr.bf16.gmra.mrb[8].mxu1 %v1079_v41  ;;  %vm894_vm15 = vcmp.gt.f32.partialorder %v676_v45, 0.0 }
 0x11d   : > { %vm897_vm0 = vcmp.gt.f32.partialorder %v687_v48, 0.0  ;;  %v961_v53 = vmul.f32 0.01, %v687_v48  ;;  %v1024_v55 = vsel %vm896_vm14, %v684_v42, %v960_v47 }
 0x11e   : > { %vm895_vm1 = vcmp.gt.f32.partialorder %v679_v52, 0.0  ;;  %v959_v54 = vmul.f32 0.01, %v679_v52  ;;  %v1022_v58 = vsel %vm894_vm15, %v676_v45, %v958_v51 }
 0x11f   : > { %v1025_v56 = vsel %vm897_vm0, %v687_v48, %v961_v53 }
 0x120   : > { %v2927_v57 = vpop.f32.mrb[16].mxu0  ;;  %v1023_v59 = vsel %vm895_vm1, %v679_v52, %v959_v54  ;;  %v1081_v60 = vpack.c.bf16 %v1025_v56, %v1024_v55 }
 0x121   : > { %v700_v61 = vadd.f32 %v2927_v57, %v3521_v49  ;;  %v691_v62 = vpop.f32.mrb[17].mxu0  ;;  %v1080_v63 = vpack.c.bf16 %v1023_v59, %v1022_v58 }
 0x122   : > { %v692_v0 = vadd.f32 %v3521_v49, %v691_v62  ;;  %v2928_v1 = vpop.f32.mrb[18].mxu0 }
 0x123   : > { %v964_v2 = vmul.f32 0.01, %v700_v61  ;;  %v703_v3 = vadd.f32 %v2928_v1, %v3521_v49  ;;  %v694_v4 = vpop.f32.mrb[19].mxu0  ;;  %3001 = vmatprep.mubr.bf16.mxu1 %v1080_v63  ;;  %vm900_vm2 = vcmp.gt.f32.partialorder %v700_v61, 0.0 }
 0x124   : > { %v962_v5 = vmul.f32 0.01, %v692_v0  ;;  %v695_v6 = vadd.f32 %v3521_v49, %v694_v4  ;;  %3002 = vmatmul.mubr.bf16.gmra.mrb[12].mxu1 %v1081_v60  ;;  %vm898_vm3 = vcmp.gt.f32.partialorder %v692_v0, 0.0 }
 0x125   : > { %vm901_vm4 = vcmp.gt.f32.partialorder %v703_v3, 0.0  ;;  %v965_v7 = vmul.f32 0.01, %v703_v3  ;;  %v1028_v9 = vsel %vm900_vm2, %v700_v61, %v964_v2 }
 0x126   : > { %vm899_vm5 = vcmp.gt.f32.partialorder %v695_v6, 0.0  ;;  %v963_v8 = vmul.f32 0.01, %v695_v6  ;;  %v1026_v12 = vsel %vm898_vm3, %v692_v0, %v962_v5 }
 0x127   : > { %v1029_v10 = vsel %vm901_vm4, %v703_v3, %v965_v7 }
 0x128   : > { %v2931_v11 = vpop.f32.mrb[20].mxu0  ;;  %v1027_v13 = vsel %vm899_vm5, %v695_v6, %v963_v8  ;;  %v1083_v14 = vpack.c.bf16 %v1029_v10, %v1028_v9 }
 0x129   : > { %v716_v15 = vadd.f32 %v2931_v11, %v3521_v49  ;;  %v707_v16 = vpop.f32.mrb[21].mxu0  ;;  %v1082_v17 = vpack.c.bf16 %v1027_v13, %v1026_v12 }
 0x12a   : > { %v708_v18 = vadd.f32 %v3521_v49, %v707_v16  ;;  %v2932_v19 = vpop.f32.mrb[22].mxu0 }
 0x12b   : > { %v968_v20 = vmul.f32 0.01, %v716_v15  ;;  %v719_v21 = vadd.f32 %v2932_v19, %v3521_v49  ;;  %v710_v22 = vpop.f32.mrb[23].mxu0  ;;  %3005 = vmatprep.mubr.bf16.mxu1 %v1082_v17  ;;  %vm904_vm6 = vcmp.gt.f32.partialorder %v716_v15, 0.0 }
 0x12c   : > { %v966_v23 = vmul.f32 0.01, %v708_v18  ;;  %v711_v24 = vadd.f32 %v3521_v49, %v710_v22  ;;  %3006 = vmatmul.mubr.bf16.gmra.mrb[16].mxu1 %v1083_v14  ;;  %vm902_vm7 = vcmp.gt.f32.partialorder %v708_v18, 0.0 }
 0x12d   : > { %vm905_vm8 = vcmp.gt.f32.partialorder %v719_v21, 0.0  ;;  %v969_v25 = vmul.f32 0.01, %v719_v21  ;;  %v1032_v27 = vsel %vm904_vm6, %v716_v15, %v968_v20 }
 0x12e   : > { %vm903_vm9 = vcmp.gt.f32.partialorder %v711_v24, 0.0  ;;  %v967_v26 = vmul.f32 0.01, %v711_v24  ;;  %v1030_v30 = vsel %vm902_vm7, %v708_v18, %v966_v23 }
 0x12f   : > { %v1033_v28 = vsel %vm905_vm8, %v719_v21, %v969_v25 }
 0x130   : > { %v2935_v29 = vpop.f32.mrb[24].mxu0  ;;  %v1031_v31 = vsel %vm903_vm9, %v711_v24, %v967_v26  ;;  %v1085_v32 = vpack.c.bf16 %v1033_v28, %v1032_v27 }
 0x131   : > { %v732_v33 = vadd.f32 %v2935_v29, %v3521_v49  ;;  %v723_v34 = vpop.f32.mrb[25].mxu0  ;;  %v1084_v35 = vpack.c.bf16 %v1031_v31, %v1030_v30 }
 0x132   : > { %v724_v36 = vadd.f32 %v3521_v49, %v723_v34  ;;  %v2936_v37 = vpop.f32.mrb[26].mxu0 }
 0x133   : > { %v972_v38 = vmul.f32 0.01, %v732_v33  ;;  %v735_v39 = vadd.f32 %v2936_v37, %v3521_v49  ;;  %v726_v40 = vpop.f32.mrb[27].mxu0  ;;  %3009 = vmatprep.mubr.bf16.mxu1 %v1084_v35  ;;  %vm908_vm10 = vcmp.gt.f32.partialorder %v732_v33, 0.0 }
 0x134   : > { %v970_v41 = vmul.f32 0.01, %v724_v36  ;;  %v727_v42 = vadd.f32 %v3521_v49, %v726_v40  ;;  %3010 = vmatmul.mubr.bf16.gmra.mrb[20].mxu1 %v1085_v32  ;;  %vm906_vm11 = vcmp.gt.f32.partialorder %v724_v36, 0.0 }
 0x135   : > { %vm909_vm12 = vcmp.gt.f32.partialorder %v735_v39, 0.0  ;;  %v973_v43 = vmul.f32 0.01, %v735_v39  ;;  %v1036_v45 = vsel %vm908_vm10, %v732_v33, %v972_v38 }
 0x136   : > { %vm907_vm13 = vcmp.gt.f32.partialorder %v727_v42, 0.0  ;;  %v971_v44 = vmul.f32 0.01, %v727_v42  ;;  %v1034_v48 = vsel %vm906_vm11, %v724_v36, %v970_v41 }
 0x137   : > { %v1037_v46 = vsel %vm909_vm12, %v735_v39, %v973_v43 }
 0x138   : > { %v2939_v47 = vpop.f32.mrb[28].mxu0  ;;  %v1035_v50 = vsel %vm907_vm13, %v727_v42, %v971_v44  ;;  %v1087_v51 = vpack.c.bf16 %v1037_v46, %v1036_v45 }
 0x139   : > { %v748_v52 = vadd.f32 %v2939_v47, %v3521_v49  ;;  %v739_v53 = vpop.f32.mrb[29].mxu0  ;;  %v1086_v54 = vpack.c.bf16 %v1035_v50, %v1034_v48 }
 0x13a   : > { %v740_v55 = vadd.f32 %v3521_v49, %v739_v53  ;;  %v2940_v56 = vpop.f32.mrb[30].mxu0 }
 0x13b   : > { %v976_v57 = vmul.f32 0.01, %v748_v52  ;;  %v751_v58 = vadd.f32 %v2940_v56, %v3521_v49  ;;  %v742_v59 = vpop.f32.mrb[31].mxu0  ;;  %3013 = vmatprep.mubr.bf16.mxu1 %v1086_v54  ;;  %vm912_vm14 = vcmp.gt.f32.partialorder %v748_v52, 0.0 }
 0x13c   : > { %v974_v60 = vmul.f32 0.01, %v740_v55  ;;  %v743_v61 = vadd.f32 %v3521_v49, %v742_v59  ;;  %3014 = vmatmul.mubr.bf16.gmra.mrb[24].mxu1 %v1087_v51  ;;  %vm910_vm15 = vcmp.gt.f32.partialorder %v740_v55, 0.0 }
 0x13d   : > { %vm913_vm0 = vcmp.gt.f32.partialorder %v751_v58, 0.0  ;;  %v977_v62 = vmul.f32 0.01, %v751_v58  ;;  %v1040_v0 = vsel %vm912_vm14, %v748_v52, %v976_v57 }
 0x13e   : > { %vm911_vm1 = vcmp.gt.f32.partialorder %v743_v61, 0.0  ;;  %v975_v63 = vmul.f32 0.01, %v743_v61  ;;  %v1038_v3 = vsel %vm910_vm15, %v740_v55, %v974_v60 }
 0x13f   : > { %v1041_v1 = vsel %vm913_vm0, %v751_v58, %v977_v62 }
 0x140   : > { %v2943_v2 = vpop.f32.mrb[32].mxu0  ;;  %v1039_v4 = vsel %vm911_vm1, %v743_v61, %v975_v63  ;;  %v1089_v5 = vpack.c.bf16 %v1041_v1, %v1040_v0 }
 0x141   : > { %v764_v6 = vadd.f32 %v2943_v2, %v3521_v49  ;;  %v755_v7 = vpop.f32.mrb[33].mxu0  ;;  %v1088_v8 = vpack.c.bf16 %v1039_v4, %v1038_v3 }
 0x142   : > { %v756_v9 = vadd.f32 %v3521_v49, %v755_v7  ;;  %v2944_v10 = vpop.f32.mrb[34].mxu0 }
 0x143   : > { %v980_v11 = vmul.f32 0.01, %v764_v6  ;;  %v767_v12 = vadd.f32 %v2944_v10, %v3521_v49  ;;  %v758_v13 = vpop.f32.mrb[35].mxu0  ;;  %3017 = vmatprep.mubr.bf16.mxu1 %v1088_v8  ;;  %vm916_vm2 = vcmp.gt.f32.partialorder %v764_v6, 0.0 }
 0x144   : > { %v978_v14 = vmul.f32 0.01, %v756_v9  ;;  %v759_v15 = vadd.f32 %v3521_v49, %v758_v13  ;;  %3018 = vmatmul.mubr.bf16.gmra.mrb[28].mxu1 %v1089_v5  ;;  %vm914_vm3 = vcmp.gt.f32.partialorder %v756_v9, 0.0 }
 0x145   : > { %vm917_vm4 = vcmp.gt.f32.partialorder %v767_v12, 0.0  ;;  %v981_v16 = vmul.f32 0.01, %v767_v12  ;;  %v1044_v18 = vsel %vm916_vm2, %v764_v6, %v980_v11 }
 0x146   : > { %vm915_vm5 = vcmp.gt.f32.partialorder %v759_v15, 0.0  ;;  %v979_v17 = vmul.f32 0.01, %v759_v15  ;;  %v1042_v21 = vsel %vm914_vm3, %v756_v9, %v978_v14 }
 0x147   : > { %v1045_v19 = vsel %vm917_vm4, %v767_v12, %v981_v16 }
 0x148   : > { %v2947_v20 = vpop.f32.mrb[36].mxu0  ;;  %v1043_v22 = vsel %vm915_vm5, %v759_v15, %v979_v17  ;;  %v1091_v23 = vpack.c.bf16 %v1045_v19, %v1044_v18  ;;  %v3201_v18 = vld [vmem:[%s4037_s5 + $0x10] sm:$0xff]  }
 0x149   : > { %v780_v24 = vadd.f32 %v2947_v20, %v3521_v49  ;;  %v771_v25 = vpop.f32.mrb[37].mxu0  ;;  %v1090_v26 = vpack.c.bf16 %v1043_v22, %v1042_v21  ;;  %3057 = vmatprep.subr.bf16.mxu0 %v3201_v18 }
 0x14a   : > { %v772_v27 = vadd.f32 %v3521_v49, %v771_v25  ;;  %v2948_v28 = vpop.f32.mrb[38].mxu0  ;;  %3058 = vmatpush3.bf16.msra.mxu0 %v3201_v18 }
 0x14b   : > { %v984_v29 = vmul.f32 0.01, %v780_v24  ;;  %v783_v30 = vadd.f32 %v2948_v28, %v3521_v49  ;;  %v774_v31 = vpop.f32.mrb[39].mxu0  ;;  %3021 = vmatprep.mubr.bf16.mxu1 %v1090_v26  ;;  %vm920_vm6 = vcmp.gt.f32.partialorder %v780_v24, 0.0 }
 0x14c   : > { %v982_v32 = vmul.f32 0.01, %v772_v27  ;;  %v775_v33 = vadd.f32 %v3521_v49, %v774_v31  ;;  %3022 = vmatmul.mubr.bf16.gmra.mrb[32].mxu1 %v1091_v23  ;;  %vm918_vm7 = vcmp.gt.f32.partialorder %v772_v27, 0.0 }
 0x14d   : > { %vm921_vm8 = vcmp.gt.f32.partialorder %v783_v30, 0.0  ;;  %v985_v34 = vmul.f32 0.01, %v783_v30  ;;  %v1048_v36 = vsel %vm920_vm6, %v780_v24, %v984_v29 }
 0x14e   : > { %vm919_vm9 = vcmp.gt.f32.partialorder %v775_v33, 0.0  ;;  %v983_v35 = vmul.f32 0.01, %v775_v33  ;;  %v1046_v39 = vsel %vm918_vm7, %v772_v27, %v982_v32  ;;  %v3202_v27 = vld [vmem:[%s4037_s5 + $0x18] sm:$0xff]  }
 0x14f   : > { %v1049_v37 = vsel %vm921_vm8, %v783_v30, %v985_v34  ;;  %3059 = vmatprep.subr.bf16.mxu0 %v3202_v27 }
 0x150   : > { %v2951_v38 = vpop.f32.mrb[40].mxu0  ;;  %v1047_v40 = vsel %vm919_vm9, %v775_v33, %v983_v35  ;;  %v1093_v41 = vpack.c.bf16 %v1049_v37, %v1048_v36  ;;  %3060 = vmatpush3.bf16.msra.mxu0 %v3202_v27 }
 0x151   : > { %v796_v42 = vadd.f32 %v2951_v38, %v3521_v49  ;;  %v787_v43 = vpop.f32.mrb[41].mxu0  ;;  %v1092_v44 = vpack.c.bf16 %v1047_v40, %v1046_v39 }
 0x152   : > { %v788_v45 = vadd.f32 %v3521_v49, %v787_v43  ;;  %v2952_v46 = vpop.f32.mrb[42].mxu0 }
 0x153   : > { %v988_v47 = vmul.f32 0.01, %v796_v42  ;;  %v799_v48 = vadd.f32 %v2952_v46, %v3521_v49  ;;  %v790_v50 = vpop.f32.mrb[43].mxu0  ;;  %3025 = vmatprep.mubr.bf16.mxu1 %v1092_v44  ;;  %vm924_vm10 = vcmp.gt.f32.partialorder %v796_v42, 0.0 }
 0x154   : > { %v986_v51 = vmul.f32 0.01, %v788_v45  ;;  %v791_v52 = vadd.f32 %v3521_v49, %v790_v50  ;;  %3026 = vmatmul.mubr.bf16.gmra.mrb[36].mxu1 %v1093_v41  ;;  %vm922_vm11 = vcmp.gt.f32.partialorder %v788_v45, 0.0 }
 0x155   : > { %vm925_vm12 = vcmp.gt.f32.partialorder %v799_v48, 0.0  ;;  %v989_v53 = vmul.f32 0.01, %v799_v48  ;;  %v1052_v55 = vsel %vm924_vm10, %v796_v42, %v988_v47 }
 0x156   : > { %vm923_vm13 = vcmp.gt.f32.partialorder %v791_v52, 0.0  ;;  %v987_v54 = vmul.f32 0.01, %v791_v52  ;;  %v1050_v58 = vsel %vm922_vm11, %v788_v45, %v986_v51 }
 0x157   : > { %v1053_v56 = vsel %vm925_vm12, %v799_v48, %v989_v53 }
 0x158   : > { %v2955_v57 = vpop.f32.mrb[44].mxu0  ;;  %v1051_v59 = vsel %vm923_vm13, %v791_v52, %v987_v54  ;;  %v1095_v60 = vpack.c.bf16 %v1053_v56, %v1052_v55 }
 0x159   : > { %v812_v61 = vadd.f32 %v2955_v57, %v3521_v49  ;;  %v803_v62 = vpop.f32.mrb[45].mxu0  ;;  %v1094_v63 = vpack.c.bf16 %v1051_v59, %v1050_v58 }
 0x15a   : > { %v804_v0 = vadd.f32 %v3521_v49, %v803_v62  ;;  %v2956_v1 = vpop.f32.mrb[46].mxu0 }
 0x15b   : > { %v992_v2 = vmul.f32 0.01, %v812_v61  ;;  %v815_v3 = vadd.f32 %v2956_v1, %v3521_v49  ;;  %v806_v4 = vpop.f32.mrb[47].mxu0  ;;  %3029 = vmatprep.mubr.bf16.mxu1 %v1094_v63  ;;  %vm928_vm14 = vcmp.gt.f32.partialorder %v812_v61, 0.0 }
 0x15c   : > { %v990_v5 = vmul.f32 0.01, %v804_v0  ;;  %v807_v6 = vadd.f32 %v3521_v49, %v806_v4  ;;  %3030 = vmatmul.mubr.bf16.gmra.mrb[40].mxu1 %v1095_v60  ;;  %vm926_vm15 = vcmp.gt.f32.partialorder %v804_v0, 0.0 }
 0x15d   : > { %vm929_vm0 = vcmp.gt.f32.partialorder %v815_v3, 0.0  ;;  %v993_v7 = vmul.f32 0.01, %v815_v3  ;;  %v1056_v9 = vsel %vm928_vm14, %v812_v61, %v992_v2 }
 0x15e   : > { %vm927_vm1 = vcmp.gt.f32.partialorder %v807_v6, 0.0  ;;  %v991_v8 = vmul.f32 0.01, %v807_v6  ;;  %v1054_v12 = vsel %vm926_vm15, %v804_v0, %v990_v5 }
 0x15f   : > { %v1057_v10 = vsel %vm929_vm0, %v815_v3, %v993_v7 }
 0x160   : > { %v2959_v11 = vpop.f32.mrb[48].mxu0  ;;  %v1055_v13 = vsel %vm927_vm1, %v807_v6, %v991_v8  ;;  %v1097_v14 = vpack.c.bf16 %v1057_v10, %v1056_v9 }
 0x161   : > { %v828_v15 = vadd.f32 %v2959_v11, %v3521_v49  ;;  %v819_v16 = vpop.f32.mrb[49].mxu0  ;;  %v1096_v17 = vpack.c.bf16 %v1055_v13, %v1054_v12 }
 0x162   : > { %v820_v19 = vadd.f32 %v3521_v49, %v819_v16  ;;  %v2960_v20 = vpop.f32.mrb[50].mxu0 }
 0x163   : > { %v996_v21 = vmul.f32 0.01, %v828_v15  ;;  %v831_v22 = vadd.f32 %v2960_v20, %v3521_v49  ;;  %v822_v23 = vpop.f32.mrb[51].mxu0  ;;  %3033 = vmatprep.mubr.bf16.mxu1 %v1096_v17  ;;  %vm932_vm2 = vcmp.gt.f32.partialorder %v828_v15, 0.0 }
 0x164   : > { %v994_v24 = vmul.f32 0.01, %v820_v19  ;;  %v823_v25 = vadd.f32 %v3521_v49, %v822_v23  ;;  %3034 = vmatmul.mubr.bf16.gmra.mrb[44].mxu1 %v1097_v14  ;;  %vm930_vm3 = vcmp.gt.f32.partialorder %v820_v19, 0.0 }
 0x165   : > { %vm933_vm4 = vcmp.gt.f32.partialorder %v831_v22, 0.0  ;;  %v997_v26 = vmul.f32 0.01, %v831_v22  ;;  %v1060_v29 = vsel %vm932_vm2, %v828_v15, %v996_v21 }
 0x166   : > { %vm931_vm5 = vcmp.gt.f32.partialorder %v823_v25, 0.0  ;;  %v995_v28 = vmul.f32 0.01, %v823_v25  ;;  %v1058_v31 = vsel %vm930_vm3, %v820_v19, %v994_v24 }
 0x167   : > { %v1061_v30 = vsel %vm933_vm4, %v831_v22, %v997_v26  ;;  %v3602_v26 = vld [vmem:[%s4036_s4] ss:$0 sm:$0xff] }
 0x168   : > { %v1059_v32 = vsel %vm931_vm5, %v823_v25, %v995_v28  ;;  %v1099_v33 = vpack.c.bf16 %v1061_v30, %v1060_v29  ;;  %v2963_v34 = vpop.f32.mrb[52].mxu0 }
 0x169   : > { %v1098_v35 = vpack.c.bf16 %v1059_v32, %v1058_v31  ;;  %v844_v36 = vadd.f32 %v2963_v34, %v3521_v49  ;;  %v835_v37 = vpop.f32.mrb[53].mxu0 }
 0x16a   : > { %v836_v38 = vadd.f32 %v3521_v49, %v835_v37  ;;  %v2964_v39 = vpop.f32.mrb[54].mxu0 }
 0x16b   : > { %3037 = vmatprep.mubr.bf16.mxu1 %v1098_v35  ;;  %vm936_vm6 = vcmp.gt.f32.partialorder %v844_v36, 0.0  ;;  %v1000_v40 = vmul.f32 0.01, %v844_v36  ;;  %v847_v41 = vadd.f32 %v2964_v39, %v3521_v49  ;;  %v838_v42 = vpop.f32.mrb[55].mxu0 }
 0x16c   : > { %3038 = vmatmul.mubr.bf16.gmra.mrb[48].mxu1 %v1099_v33  ;;  %vm934_vm7 = vcmp.gt.f32.partialorder %v836_v38, 0.0  ;;  %v998_v43 = vmul.f32 0.01, %v836_v38  ;;  %v839_v44 = vadd.f32 %v3521_v49, %v838_v42 }
 0x16d   : > { %vm937_vm8 = vcmp.gt.f32.partialorder %v847_v41, 0.0  ;;  %v1001_v45 = vmul.f32 0.01, %v847_v41  ;;  %v1064_v46 = vsel %vm936_vm6, %v844_v36, %v1000_v40  ;;  %vm1729_vm6 = vcmask 523264  }
 0x16e   : > { %vm935_vm9 = vcmp.gt.f32.partialorder %v839_v44, 0.0  ;;  %v999_v47 = vmul.f32 0.01, %v839_v44  ;;  %v1062_v48 = vsel %vm934_vm7, %v836_v38, %v998_v43 }
 0x16f   : > { %v1065_v50 = vsel %vm937_vm8, %v847_v41, %v1001_v45 }
 0x170   : > { %v1063_v51 = vsel %vm935_vm9, %v839_v44, %v999_v47  ;;  %v1101_v52 = vpack.c.bf16 %v1065_v50, %v1064_v46  ;;  %v2967_v53 = vpop.f32.mrb[56].mxu0 }
 0x171   : > { %v1100_v54 = vpack.c.bf16 %v1063_v51, %v1062_v48  ;;  %v860_v55 = vadd.f32 %v2967_v53, %v3521_v49  ;;  %v851_v56 = vpop.f32.mrb[57].mxu0 }
 0x172   : > { %v852_v57 = vadd.f32 %v3521_v49, %v851_v56  ;;  %v2968_v58 = vpop.f32.mrb[58].mxu0 }
 0x173   : > { %3041 = vmatprep.mubr.bf16.mxu1 %v1100_v54  ;;  %vm940_vm10 = vcmp.gt.f32.partialorder %v860_v55, 0.0  ;;  %v1004_v59 = vmul.f32 0.01, %v860_v55  ;;  %v863_v60 = vadd.f32 %v2968_v58, %v3521_v49  ;;  %v854_v61 = vpop.f32.mrb[59].mxu0 }
 0x174   : > { %3042 = vmatmul.mubr.bf16.gmra.mrb[52].mxu1 %v1101_v52  ;;  %vm938_vm11 = vcmp.gt.f32.partialorder %v852_v57, 0.0  ;;  %v1002_v62 = vmul.f32 0.01, %v852_v57  ;;  %v855_v63 = vadd.f32 %v3521_v49, %v854_v61 }
 0x175   : > { %vm941_vm12 = vcmp.gt.f32.partialorder %v863_v60, 0.0  ;;  %v1005_v0 = vmul.f32 0.01, %v863_v60  ;;  %v1068_v1 = vsel %vm940_vm10, %v860_v55, %v1004_v59 }
 0x176   : > { %vm939_vm13 = vcmp.gt.f32.partialorder %v855_v63, 0.0  ;;  %v1003_v2 = vmul.f32 0.01, %v855_v63  ;;  %v1066_v3 = vsel %vm938_vm11, %v852_v57, %v1002_v62 }
 0x177   : > { %v1069_v4 = vsel %vm941_vm12, %v863_v60, %v1005_v0 }
 0x178   : > { %v1067_v5 = vsel %vm939_vm13, %v855_v63, %v1003_v2  ;;  %v1103_v6 = vpack.c.bf16 %v1069_v4, %v1068_v1  ;;  %v2971_v7 = vpop.f32.mrb[60].mxu0 }
 0x179   : > { %v1102_v8 = vpack.c.bf16 %v1067_v5, %v1066_v3  ;;  %v876_v9 = vadd.f32 %v2971_v7, %v3521_v49  ;;  %v867_v10 = vpop.f32.mrb[61].mxu0 }
 0x17a   : > { %v868_v11 = vadd.f32 %v3521_v49, %v867_v10  ;;  %v2972_v12 = vpop.f32.mrb[62].mxu0 }
 0x17b   : > { %3045 = vmatprep.mubr.bf16.mxu1 %v1102_v8  ;;  %vm944_vm14 = vcmp.gt.f32.partialorder %v876_v9, 0.0  ;;  %v1008_v13 = vmul.f32 0.01, %v876_v9  ;;  %v879_v14 = vadd.f32 %v2972_v12, %v3521_v49  ;;  %v870_v15 = vpop.f32.mrb[63].mxu0 }
 0x17c   : > { %3046 = vmatmul.mubr.bf16.gmra.mrb[56].mxu1 %v1103_v6  ;;  %vm942_vm15 = vcmp.gt.f32.partialorder %v868_v11, 0.0  ;;  %v1006_v16 = vmul.f32 0.01, %v868_v11  ;;  %v871_v17 = vadd.f32 %v3521_v49, %v870_v15 }
 0x17d   : > { %vm945_vm0 = vcmp.gt.f32.partialorder %v879_v14, 0.0  ;;  %v1009_v18 = vmul.f32 0.01, %v879_v14  ;;  %v1072_v19 = vsel %vm944_vm14, %v876_v9, %v1008_v13 }
 0x17e   : > { %vm943_vm1 = vcmp.gt.f32.partialorder %v871_v17, 0.0  ;;  %v1007_v20 = vmul.f32 0.01, %v871_v17  ;;  %v1070_v21 = vsel %vm942_vm15, %v868_v11, %v1006_v16 }
 0x17f   : > { %v1073_v22 = vsel %vm945_vm0, %v879_v14, %v1009_v18 }
 0x180   : > { %v1071_v23 = vsel %vm943_vm1, %v871_v17, %v1007_v20  ;;  %v1105_v24 = vpack.c.bf16 %v1073_v22, %v1072_v19 }
 0x181   : > { %v1104_v25 = vpack.c.bf16 %v1071_v23, %v1070_v21 }
 0x183   : > { %3049 = vmatprep.mubr.bf16.mxu1 %v1104_v25 }
 0x184   : > { %3050 = vmatmul.mubr.bf16.gmra.mrb[60].mxu1 %v1105_v24 }
 0x1df   : > { %v2991_v27 = vpop.f32.mrb[0].mxu1 }
 0x1e0   : > { %v1220_v49 = vadd.f32 %v2991_v27, %v3602_v26  ;;  %v1211_v28 = vpop.f32.mrb[1].mxu1 }
 0x1e1   : > { %v1212_v29 = vadd.f32 %v3602_v26, %v1211_v28  ;;  %v2992_v30 = vpop.f32.mrb[2].mxu1 }
 0x1e2   : > { %v1532_v31 = vmul.f32 0.01, %v1220_v49  ;;  %v1223_v32 = vadd.f32 %v2992_v30, %v3602_v26  ;;  %v1214_v33 = vpop.f32.mrb[3].mxu1  ;;  %vm1468_vm2 = vcmp.gt.f32.partialorder %v1220_v49, 0.0 }
 0x1e3   : > { %v1530_v34 = vmul.f32 0.01, %v1212_v29  ;;  %v1215_v35 = vadd.f32 %v3602_v26, %v1214_v33  ;;  %vm1466_vm3 = vcmp.gt.f32.partialorder %v1212_v29, 0.0 }
 0x1e4   : > { %vm1469_vm4 = vcmp.gt.f32.partialorder %v1223_v32, 0.0  ;;  %v1533_v36 = vmul.f32 0.01, %v1223_v32  ;;  %v1596_v38 = vsel %vm1468_vm2, %v1220_v49, %v1532_v31 }
 0x1e5   : > { %vm1467_vm5 = vcmp.gt.f32.partialorder %v1215_v35, 0.0  ;;  %v1531_v37 = vmul.f32 0.01, %v1215_v35  ;;  %v1594_v40 = vsel %vm1466_vm3, %v1212_v29, %v1530_v34 }
 0x1e6   : > { %v1597_v39 = vsel %vm1469_vm4, %v1223_v32, %v1533_v36 }
 0x1e7   : > { %v1659_v41 = vpack.c.bf16 %v1597_v39, %v1596_v38  ;;  %v1595_v42 = vsel %vm1467_vm5, %v1215_v35, %v1531_v37  ;;  %v2995_v43 = vpop.f32.mrb[4].mxu1 }
 0x1e8   : > { %v1658_v44 = vpack.c.bf16 %v1595_v42, %v1594_v40  ;;  %v1236_v45 = vadd.f32 %v2995_v43, %v3602_v26  ;;  %v1227_v46 = vpop.f32.mrb[5].mxu1 }
 0x1e9   : > { %v1228_v47 = vadd.f32 %v3602_v26, %v1227_v46  ;;  %v2996_v48 = vpop.f32.mrb[6].mxu1 }
 0x1ea   : > { %v1536_v50 = vmul.f32 0.01, %v1236_v45  ;;  %v1239_v51 = vadd.f32 %v2996_v48, %v3602_v26  ;;  %v1230_v52 = vpop.f32.mrb[7].mxu1  ;;  %3061 = vmatprep.mubr.msk.bf16.mxu0 %vm1729_vm6, %v1658_v44  ;;  %vm1472_vm7 = vcmp.gt.f32.partialorder %v1236_v45, 0.0 }
 0x1eb   : > { %v1534_v53 = vmul.f32 0.01, %v1228_v47  ;;  %v1231_v54 = vadd.f32 %v3602_v26, %v1230_v52  ;;  %3062 = vmatmul.mubr.msk.bf16.vlgmr.msra.gmra.mrb[64].mxu0 %vm1729_vm6, %v1659_v41  ;;  %vm1470_vm8 = vcmp.gt.f32.partialorder %v1228_v47, 0.0 }
 0x1ec   : > { %vm1473_vm9 = vcmp.gt.f32.partialorder %v1239_v51, 0.0  ;;  %v1537_v55 = vmul.f32 0.01, %v1239_v51  ;;  %v1600_v57 = vsel %vm1472_vm7, %v1236_v45, %v1536_v50 }
 0x1ed   : > { %vm1471_vm10 = vcmp.gt.f32.partialorder %v1231_v54, 0.0  ;;  %v1535_v56 = vmul.f32 0.01, %v1231_v54  ;;  %v1598_v59 = vsel %vm1470_vm8, %v1228_v47, %v1534_v53 }
 0x1ee   : > { %v1601_v58 = vsel %vm1473_vm9, %v1239_v51, %v1537_v55 }
 0x1ef   : > { %v1661_v60 = vpack.c.bf16 %v1601_v58, %v1600_v57  ;;  %v1599_v61 = vsel %vm1471_vm10, %v1231_v54, %v1535_v56  ;;  %v2999_v62 = vpop.f32.mrb[8].mxu1 }
 0x1f0   : > { %v1660_v63 = vpack.c.bf16 %v1599_v61, %v1598_v59  ;;  %v1252_v0 = vadd.f32 %v2999_v62, %v3602_v26  ;;  %v1243_v1 = vpop.f32.mrb[9].mxu1 }
 0x1f1   : > { %v1244_v2 = vadd.f32 %v3602_v26, %v1243_v1  ;;  %v3000_v3 = vpop.f32.mrb[10].mxu1 }
 0x1f2   : > { %v1540_v4 = vmul.f32 0.01, %v1252_v0  ;;  %v1255_v5 = vadd.f32 %v3000_v3, %v3602_v26  ;;  %v1246_v6 = vpop.f32.mrb[11].mxu1  ;;  %3065 = vmatprep.mubr.msk.bf16.mxu0 %vm1729_vm6, %v1660_v63  ;;  %vm1476_vm11 = vcmp.gt.f32.partialorder %v1252_v0, 0.0 }
 0x1f3   : > { %v1538_v7 = vmul.f32 0.01, %v1244_v2  ;;  %v1247_v8 = vadd.f32 %v3602_v26, %v1246_v6  ;;  %3066 = vmatmul.mubr.msk.bf16.gmra.mrb[68].mxu0 %vm1729_vm6, %v1661_v60  ;;  %vm1474_vm12 = vcmp.gt.f32.partialorder %v1244_v2, 0.0 }
 0x1f4   : > { %vm1477_vm13 = vcmp.gt.f32.partialorder %v1255_v5, 0.0  ;;  %v1541_v9 = vmul.f32 0.01, %v1255_v5  ;;  %v1604_v11 = vsel %vm1476_vm11, %v1252_v0, %v1540_v4 }
 0x1f5   : > { %vm1475_vm14 = vcmp.gt.f32.partialorder %v1247_v8, 0.0  ;;  %v1539_v10 = vmul.f32 0.01, %v1247_v8  ;;  %v1602_v13 = vsel %vm1474_vm12, %v1244_v2, %v1538_v7 }
 0x1f6   : > { %v1605_v12 = vsel %vm1477_vm13, %v1255_v5, %v1541_v9 }
 0x1f7   : > { %v1663_v14 = vpack.c.bf16 %v1605_v12, %v1604_v11  ;;  %v1603_v15 = vsel %vm1475_vm14, %v1247_v8, %v1539_v10  ;;  %v3003_v16 = vpop.f32.mrb[12].mxu1 }
 0x1f8   : > { %v1662_v17 = vpack.c.bf16 %v1603_v15, %v1602_v13  ;;  %v1268_v18 = vadd.f32 %v3003_v16, %v3602_v26  ;;  %v1259_v19 = vpop.f32.mrb[13].mxu1 }
 0x1f9   : > { %v1260_v20 = vadd.f32 %v3602_v26, %v1259_v19  ;;  %v3004_v21 = vpop.f32.mrb[14].mxu1 }
 0x1fa   : > { %v1544_v22 = vmul.f32 0.01, %v1268_v18  ;;  %v1271_v23 = vadd.f32 %v3004_v21, %v3602_v26  ;;  %v1262_v24 = vpop.f32.mrb[15].mxu1  ;;  %3069 = vmatprep.mubr.msk.bf16.mxu0 %vm1729_vm6, %v1662_v17  ;;  %vm1480_vm15 = vcmp.gt.f32.partialorder %v1268_v18, 0.0 }
 0x1fb   : > { %v1542_v25 = vmul.f32 0.01, %v1260_v20  ;;  %v1263_v27 = vadd.f32 %v3602_v26, %v1262_v24  ;;  %3070 = vmatmul.mubr.msk.bf16.gmra.mrb[72].mxu0 %vm1729_vm6, %v1663_v14  ;;  %vm1478_vm0 = vcmp.gt.f32.partialorder %v1260_v20, 0.0 }
 0x1fc   : > { %vm1481_vm1 = vcmp.gt.f32.partialorder %v1271_v23, 0.0  ;;  %v1545_v49 = vmul.f32 0.01, %v1271_v23  ;;  %v1608_v29 = vsel %vm1480_vm15, %v1268_v18, %v1544_v22 }
 0x1fd   : > { %vm1479_vm2 = vcmp.gt.f32.partialorder %v1263_v27, 0.0  ;;  %v1543_v28 = vmul.f32 0.01, %v1263_v27  ;;  %v1606_v31 = vsel %vm1478_vm0, %v1260_v20, %v1542_v25 }
 0x1fe   : > { %v1609_v30 = vsel %vm1481_vm1, %v1271_v23, %v1545_v49 }
 0x1ff   : > { %v1665_v32 = vpack.c.bf16 %v1609_v30, %v1608_v29  ;;  %v1607_v33 = vsel %vm1479_vm2, %v1263_v27, %v1543_v28  ;;  %v3007_v34 = vpop.f32.mrb[16].mxu1 }
 0x200   : > { %v1664_v35 = vpack.c.bf16 %v1607_v33, %v1606_v31  ;;  %v1284_v36 = vadd.f32 %v3007_v34, %v3602_v26  ;;  %v1275_v37 = vpop.f32.mrb[17].mxu1 }
 0x201   : > { %v1276_v38 = vadd.f32 %v3602_v26, %v1275_v37  ;;  %v3008_v39 = vpop.f32.mrb[18].mxu1 }
 0x202   : > { %v1548_v40 = vmul.f32 0.01, %v1284_v36  ;;  %v1287_v41 = vadd.f32 %v3008_v39, %v3602_v26  ;;  %v1278_v42 = vpop.f32.mrb[19].mxu1  ;;  %3073 = vmatprep.mubr.msk.bf16.mxu0 %vm1729_vm6, %v1664_v35  ;;  %vm1484_vm3 = vcmp.gt.f32.partialorder %v1284_v36, 0.0 }
 0x203   : > { %v1546_v43 = vmul.f32 0.01, %v1276_v38  ;;  %v1279_v44 = vadd.f32 %v3602_v26, %v1278_v42  ;;  %3074 = vmatmul.mubr.msk.bf16.gmra.mrb[76].mxu0 %vm1729_vm6, %v1665_v32  ;;  %vm1482_vm4 = vcmp.gt.f32.partialorder %v1276_v38, 0.0 }
 0x204   : > { %vm1485_vm5 = vcmp.gt.f32.partialorder %v1287_v41, 0.0  ;;  %v1549_v45 = vmul.f32 0.01, %v1287_v41  ;;  %v1612_v47 = vsel %vm1484_vm3, %v1284_v36, %v1548_v40 }
 0x205   : > { %vm1483_vm7 = vcmp.gt.f32.partialorder %v1279_v44, 0.0  ;;  %v1547_v46 = vmul.f32 0.01, %v1279_v44  ;;  %v1610_v50 = vsel %vm1482_vm4, %v1276_v38, %v1546_v43 }
 0x206   : > { %v1613_v48 = vsel %vm1485_vm5, %v1287_v41, %v1549_v45 }
 0x207   : > { %v1667_v51 = vpack.c.bf16 %v1613_v48, %v1612_v47  ;;  %v1611_v52 = vsel %vm1483_vm7, %v1279_v44, %v1547_v46  ;;  %v3011_v53 = vpop.f32.mrb[20].mxu1 }
 0x208   : > { %v1666_v54 = vpack.c.bf16 %v1611_v52, %v1610_v50  ;;  %v1300_v55 = vadd.f32 %v3011_v53, %v3602_v26  ;;  %v1291_v56 = vpop.f32.mrb[21].mxu1 }
 0x209   : > { %v1292_v57 = vadd.f32 %v3602_v26, %v1291_v56  ;;  %v3012_v58 = vpop.f32.mrb[22].mxu1 }
 0x20a   : > { %v1552_v59 = vmul.f32 0.01, %v1300_v55  ;;  %v1303_v60 = vadd.f32 %v3012_v58, %v3602_v26  ;;  %v1294_v61 = vpop.f32.mrb[23].mxu1  ;;  %3077 = vmatprep.mubr.msk.bf16.mxu0 %vm1729_vm6, %v1666_v54  ;;  %vm1488_vm8 = vcmp.gt.f32.partialorder %v1300_v55, 0.0 }
 0x20b   : > { %v1550_v62 = vmul.f32 0.01, %v1292_v57  ;;  %v1295_v63 = vadd.f32 %v3602_v26, %v1294_v61  ;;  %3078 = vmatmul.mubr.msk.bf16.gmra.mrb[80].mxu0 %vm1729_vm6, %v1667_v51  ;;  %vm1486_vm9 = vcmp.gt.f32.partialorder %v1292_v57, 0.0 }
 0x20c   : > { %vm1489_vm10 = vcmp.gt.f32.partialorder %v1303_v60, 0.0  ;;  %v1553_v0 = vmul.f32 0.01, %v1303_v60  ;;  %v1616_v2 = vsel %vm1488_vm8, %v1300_v55, %v1552_v59 }
 0x20d   : > { %vm1487_vm11 = vcmp.gt.f32.partialorder %v1295_v63, 0.0  ;;  %v1551_v1 = vmul.f32 0.01, %v1295_v63  ;;  %v1614_v4 = vsel %vm1486_vm9, %v1292_v57, %v1550_v62 }
 0x20e   : > { %v1617_v3 = vsel %vm1489_vm10, %v1303_v60, %v1553_v0 }
 0x20f   : > { %v1669_v5 = vpack.c.bf16 %v1617_v3, %v1616_v2  ;;  %v1615_v6 = vsel %vm1487_vm11, %v1295_v63, %v1551_v1  ;;  %v3015_v7 = vpop.f32.mrb[24].mxu1 }
 0x210   : > { %v1668_v8 = vpack.c.bf16 %v1615_v6, %v1614_v4  ;;  %v1316_v9 = vadd.f32 %v3015_v7, %v3602_v26  ;;  %v1307_v10 = vpop.f32.mrb[25].mxu1 }
 0x211   : > { %v1308_v11 = vadd.f32 %v3602_v26, %v1307_v10  ;;  %v3016_v12 = vpop.f32.mrb[26].mxu1 }
 0x212   : > { %v1556_v13 = vmul.f32 0.01, %v1316_v9  ;;  %v1319_v14 = vadd.f32 %v3016_v12, %v3602_v26  ;;  %v1310_v15 = vpop.f32.mrb[27].mxu1  ;;  %3081 = vmatprep.mubr.msk.bf16.mxu0 %vm1729_vm6, %v1668_v8  ;;  %vm1492_vm12 = vcmp.gt.f32.partialorder %v1316_v9, 0.0 }
 0x213   : > { %v1554_v16 = vmul.f32 0.01, %v1308_v11  ;;  %v1311_v17 = vadd.f32 %v3602_v26, %v1310_v15  ;;  %3082 = vmatmul.mubr.msk.bf16.gmra.mrb[84].mxu0 %vm1729_vm6, %v1669_v5  ;;  %vm1490_vm13 = vcmp.gt.f32.partialorder %v1308_v11, 0.0 }
 0x214   : > { %vm1493_vm14 = vcmp.gt.f32.partialorder %v1319_v14, 0.0  ;;  %v1557_v18 = vmul.f32 0.01, %v1319_v14  ;;  %v1620_v20 = vsel %vm1492_vm12, %v1316_v9, %v1556_v13 }
 0x215   : > { %vm1491_vm15 = vcmp.gt.f32.partialorder %v1311_v17, 0.0  ;;  %v1555_v19 = vmul.f32 0.01, %v1311_v17  ;;  %v1618_v22 = vsel %vm1490_vm13, %v1308_v11, %v1554_v16 }
 0x216   : > { %v1621_v21 = vsel %vm1493_vm14, %v1319_v14, %v1557_v18 }
 0x217   : > { %v1671_v23 = vpack.c.bf16 %v1621_v21, %v1620_v20  ;;  %v1619_v24 = vsel %vm1491_vm15, %v1311_v17, %v1555_v19  ;;  %v3019_v25 = vpop.f32.mrb[28].mxu1 }
 0x218   : > { %v1670_v27 = vpack.c.bf16 %v1619_v24, %v1618_v22  ;;  %v1332_v49 = vadd.f32 %v3019_v25, %v3602_v26  ;;  %v1323_v28 = vpop.f32.mrb[29].mxu1 }
 0x219   : > { %v1324_v29 = vadd.f32 %v3602_v26, %v1323_v28  ;;  %v3020_v30 = vpop.f32.mrb[30].mxu1 }
 0x21a   : > { %v1560_v31 = vmul.f32 0.01, %v1332_v49  ;;  %v1335_v32 = vadd.f32 %v3020_v30, %v3602_v26  ;;  %v1326_v33 = vpop.f32.mrb[31].mxu1  ;;  %3085 = vmatprep.mubr.msk.bf16.mxu0 %vm1729_vm6, %v1670_v27  ;;  %vm1496_vm0 = vcmp.gt.f32.partialorder %v1332_v49, 0.0 }
 0x21b   : > { %v1558_v34 = vmul.f32 0.01, %v1324_v29  ;;  %v1327_v35 = vadd.f32 %v3602_v26, %v1326_v33  ;;  %3086 = vmatmul.mubr.msk.bf16.gmra.mrb[88].mxu0 %vm1729_vm6, %v1671_v23  ;;  %vm1494_vm1 = vcmp.gt.f32.partialorder %v1324_v29, 0.0 }
 0x21c   : > { %vm1497_vm2 = vcmp.gt.f32.partialorder %v1335_v32, 0.0  ;;  %v1561_v36 = vmul.f32 0.01, %v1335_v32  ;;  %v1624_v38 = vsel %vm1496_vm0, %v1332_v49, %v1560_v31 }
 0x21d   : > { %vm1495_vm3 = vcmp.gt.f32.partialorder %v1327_v35, 0.0  ;;  %v1559_v37 = vmul.f32 0.01, %v1327_v35  ;;  %v1622_v40 = vsel %vm1494_vm1, %v1324_v29, %v1558_v34 }
 0x21e   : > { %v1625_v39 = vsel %vm1497_vm2, %v1335_v32, %v1561_v36 }
 0x21f   : > { %v1673_v41 = vpack.c.bf16 %v1625_v39, %v1624_v38  ;;  %v1623_v42 = vsel %vm1495_vm3, %v1327_v35, %v1559_v37  ;;  %v3023_v43 = vpop.f32.mrb[32].mxu1 }
 0x220   : > { %v1672_v44 = vpack.c.bf16 %v1623_v42, %v1622_v40  ;;  %v1348_v45 = vadd.f32 %v3023_v43, %v3602_v26  ;;  %v1339_v46 = vpop.f32.mrb[33].mxu1 }
 0x221   : > { %v1340_v47 = vadd.f32 %v3602_v26, %v1339_v46  ;;  %v3024_v48 = vpop.f32.mrb[34].mxu1 }
 0x222   : > { %v1564_v50 = vmul.f32 0.01, %v1348_v45  ;;  %v1351_v51 = vadd.f32 %v3024_v48, %v3602_v26  ;;  %v1342_v52 = vpop.f32.mrb[35].mxu1  ;;  %3089 = vmatprep.mubr.msk.bf16.mxu0 %vm1729_vm6, %v1672_v44  ;;  %vm1500_vm4 = vcmp.gt.f32.partialorder %v1348_v45, 0.0 }
 0x223   : > { %v1562_v53 = vmul.f32 0.01, %v1340_v47  ;;  %v1343_v54 = vadd.f32 %v3602_v26, %v1342_v52  ;;  %3090 = vmatmul.mubr.msk.bf16.gmra.mrb[92].mxu0 %vm1729_vm6, %v1673_v41  ;;  %vm1498_vm5 = vcmp.gt.f32.partialorder %v1340_v47, 0.0 }
 0x224   : > { %vm1501_vm7 = vcmp.gt.f32.partialorder %v1351_v51, 0.0  ;;  %v1565_v55 = vmul.f32 0.01, %v1351_v51  ;;  %v1628_v57 = vsel %vm1500_vm4, %v1348_v45, %v1564_v50 }
 0x225   : > { %vm1499_vm8 = vcmp.gt.f32.partialorder %v1343_v54, 0.0  ;;  %v1563_v56 = vmul.f32 0.01, %v1343_v54  ;;  %v1626_v59 = vsel %vm1498_vm5, %v1340_v47, %v1562_v53 }
 0x226   : > { %v1629_v58 = vsel %vm1501_vm7, %v1351_v51, %v1565_v55 }
 0x227   : > { %v1675_v60 = vpack.c.bf16 %v1629_v58, %v1628_v57  ;;  %v1627_v61 = vsel %vm1499_vm8, %v1343_v54, %v1563_v56  ;;  %v3027_v62 = vpop.f32.mrb[36].mxu1 }
 0x228   : > { %v1674_v63 = vpack.c.bf16 %v1627_v61, %v1626_v59  ;;  %v1364_v0 = vadd.f32 %v3027_v62, %v3602_v26  ;;  %v1355_v1 = vpop.f32.mrb[37].mxu1 }
 0x229   : > { %v1356_v2 = vadd.f32 %v3602_v26, %v1355_v1  ;;  %v3028_v3 = vpop.f32.mrb[38].mxu1 }
 0x22a   : > { %v1568_v4 = vmul.f32 0.01, %v1364_v0  ;;  %v1367_v5 = vadd.f32 %v3028_v3, %v3602_v26  ;;  %v1358_v6 = vpop.f32.mrb[39].mxu1  ;;  %3093 = vmatprep.mubr.msk.bf16.mxu0 %vm1729_vm6, %v1674_v63  ;;  %vm1504_vm9 = vcmp.gt.f32.partialorder %v1364_v0, 0.0 }
 0x22b   : > { %v1566_v7 = vmul.f32 0.01, %v1356_v2  ;;  %v1359_v8 = vadd.f32 %v3602_v26, %v1358_v6  ;;  %3094 = vmatmul.mubr.msk.bf16.gmra.mrb[96].mxu0 %vm1729_vm6, %v1675_v60  ;;  %vm1502_vm10 = vcmp.gt.f32.partialorder %v1356_v2, 0.0 }
 0x22c   : > { %vm1505_vm11 = vcmp.gt.f32.partialorder %v1367_v5, 0.0  ;;  %v1569_v9 = vmul.f32 0.01, %v1367_v5  ;;  %v1632_v11 = vsel %vm1504_vm9, %v1364_v0, %v1568_v4 }
 0x22d   : > { %vm1503_vm12 = vcmp.gt.f32.partialorder %v1359_v8, 0.0  ;;  %v1567_v10 = vmul.f32 0.01, %v1359_v8  ;;  %v1630_v13 = vsel %vm1502_vm10, %v1356_v2, %v1566_v7 }
 0x22e   : > { %v1633_v12 = vsel %vm1505_vm11, %v1367_v5, %v1569_v9 }
 0x22f   : > { %v1677_v14 = vpack.c.bf16 %v1633_v12, %v1632_v11  ;;  %v1631_v15 = vsel %vm1503_vm12, %v1359_v8, %v1567_v10  ;;  %v3031_v16 = vpop.f32.mrb[40].mxu1 }
 0x230   : > { %v1676_v17 = vpack.c.bf16 %v1631_v15, %v1630_v13  ;;  %v1380_v18 = vadd.f32 %v3031_v16, %v3602_v26  ;;  %v1371_v19 = vpop.f32.mrb[41].mxu1 }
 0x231   : > { %v1372_v20 = vadd.f32 %v3602_v26, %v1371_v19  ;;  %v3032_v21 = vpop.f32.mrb[42].mxu1 }
 0x232   : > { %v1572_v22 = vmul.f32 0.01, %v1380_v18  ;;  %v1383_v23 = vadd.f32 %v3032_v21, %v3602_v26  ;;  %v1374_v24 = vpop.f32.mrb[43].mxu1  ;;  %3097 = vmatprep.mubr.msk.bf16.mxu0 %vm1729_vm6, %v1676_v17  ;;  %vm1508_vm13 = vcmp.gt.f32.partialorder %v1380_v18, 0.0 }
 0x233   : > { %v1570_v25 = vmul.f32 0.01, %v1372_v20  ;;  %v1375_v27 = vadd.f32 %v3602_v26, %v1374_v24  ;;  %3098 = vmatmul.mubr.msk.bf16.gmra.mrb[100].mxu0 %vm1729_vm6, %v1677_v14  ;;  %vm1506_vm14 = vcmp.gt.f32.partialorder %v1372_v20, 0.0 }
 0x234   : > { %vm1509_vm15 = vcmp.gt.f32.partialorder %v1383_v23, 0.0  ;;  %v1573_v49 = vmul.f32 0.01, %v1383_v23  ;;  %v1636_v29 = vsel %vm1508_vm13, %v1380_v18, %v1572_v22 }
 0x235   : > { %vm1507_vm0 = vcmp.gt.f32.partialorder %v1375_v27, 0.0  ;;  %v1571_v28 = vmul.f32 0.01, %v1375_v27  ;;  %v1634_v31 = vsel %vm1506_vm14, %v1372_v20, %v1570_v25 }
 0x236   : > { %v1637_v30 = vsel %vm1509_vm15, %v1383_v23, %v1573_v49 }
 0x237   : > { %v1679_v32 = vpack.c.bf16 %v1637_v30, %v1636_v29  ;;  %v1635_v33 = vsel %vm1507_vm0, %v1375_v27, %v1571_v28  ;;  %v3035_v34 = vpop.f32.mrb[44].mxu1 }
 0x238   : > { %v1678_v35 = vpack.c.bf16 %v1635_v33, %v1634_v31  ;;  %v1396_v36 = vadd.f32 %v3035_v34, %v3602_v26  ;;  %v1387_v37 = vpop.f32.mrb[45].mxu1 }
 0x239   : > { %v1388_v38 = vadd.f32 %v3602_v26, %v1387_v37  ;;  %v3036_v39 = vpop.f32.mrb[46].mxu1 }
 0x23a   : > { %v1576_v40 = vmul.f32 0.01, %v1396_v36  ;;  %v1399_v41 = vadd.f32 %v3036_v39, %v3602_v26  ;;  %v1390_v42 = vpop.f32.mrb[47].mxu1  ;;  %3101 = vmatprep.mubr.msk.bf16.mxu0 %vm1729_vm6, %v1678_v35  ;;  %vm1512_vm1 = vcmp.gt.f32.partialorder %v1396_v36, 0.0 }
 0x23b   : > { %v1574_v43 = vmul.f32 0.01, %v1388_v38  ;;  %v1391_v44 = vadd.f32 %v3602_v26, %v1390_v42  ;;  %3102 = vmatmul.mubr.msk.bf16.gmra.mrb[104].mxu0 %vm1729_vm6, %v1679_v32  ;;  %vm1510_vm2 = vcmp.gt.f32.partialorder %v1388_v38, 0.0 }
 0x23c   : > { %vm1513_vm3 = vcmp.gt.f32.partialorder %v1399_v41, 0.0  ;;  %v1577_v45 = vmul.f32 0.01, %v1399_v41  ;;  %v1640_v47 = vsel %vm1512_vm1, %v1396_v36, %v1576_v40 }
 0x23d   : > { %vm1511_vm4 = vcmp.gt.f32.partialorder %v1391_v44, 0.0  ;;  %v1575_v46 = vmul.f32 0.01, %v1391_v44  ;;  %v1638_v50 = vsel %vm1510_vm2, %v1388_v38, %v1574_v43 }
 0x23e   : > { %v1641_v48 = vsel %vm1513_vm3, %v1399_v41, %v1577_v45 }
 0x23f   : > { %v1681_v51 = vpack.c.bf16 %v1641_v48, %v1640_v47  ;;  %v1639_v52 = vsel %vm1511_vm4, %v1391_v44, %v1575_v46  ;;  %v3039_v53 = vpop.f32.mrb[48].mxu1 }
 0x240   : > { %v1680_v54 = vpack.c.bf16 %v1639_v52, %v1638_v50  ;;  %v1412_v55 = vadd.f32 %v3039_v53, %v3602_v26  ;;  %v1403_v56 = vpop.f32.mrb[49].mxu1 }
 0x241   : > { %v1404_v57 = vadd.f32 %v3602_v26, %v1403_v56  ;;  %v3040_v58 = vpop.f32.mrb[50].mxu1 }
 0x242   : > { %v1580_v59 = vmul.f32 0.01, %v1412_v55  ;;  %v1415_v60 = vadd.f32 %v3040_v58, %v3602_v26  ;;  %v1406_v61 = vpop.f32.mrb[51].mxu1  ;;  %3105 = vmatprep.mubr.msk.bf16.mxu0 %vm1729_vm6, %v1680_v54  ;;  %vm1516_vm5 = vcmp.gt.f32.partialorder %v1412_v55, 0.0 }
 0x243   : > { %v1578_v62 = vmul.f32 0.01, %v1404_v57  ;;  %v1407_v63 = vadd.f32 %v3602_v26, %v1406_v61  ;;  %3106 = vmatmul.mubr.msk.bf16.gmra.mrb[108].mxu0 %vm1729_vm6, %v1681_v51  ;;  %vm1514_vm7 = vcmp.gt.f32.partialorder %v1404_v57, 0.0 }
 0x244   : > { %vm1517_vm8 = vcmp.gt.f32.partialorder %v1415_v60, 0.0  ;;  %v1581_v0 = vmul.f32 0.01, %v1415_v60  ;;  %v1644_v2 = vsel %vm1516_vm5, %v1412_v55, %v1580_v59 }
 0x245   : > { %vm1515_vm9 = vcmp.gt.f32.partialorder %v1407_v63, 0.0  ;;  %v1579_v1 = vmul.f32 0.01, %v1407_v63  ;;  %v1642_v4 = vsel %vm1514_vm7, %v1404_v57, %v1578_v62 }
 0x246   : > { %v1645_v3 = vsel %vm1517_vm8, %v1415_v60, %v1581_v0 }
 0x247   : > { %v1683_v5 = vpack.c.bf16 %v1645_v3, %v1644_v2  ;;  %v1643_v6 = vsel %vm1515_vm9, %v1407_v63, %v1579_v1  ;;  %v3043_v7 = vpop.f32.mrb[52].mxu1  ;;  %v3703_v63 = vld [vmem:[%s4039_s7] sm:$0xf] }
 0x248   : > { %v1682_v8 = vpack.c.bf16 %v1643_v6, %v1642_v4  ;;  %v1428_v9 = vadd.f32 %v3043_v7, %v3602_v26  ;;  %v1419_v10 = vpop.f32.mrb[53].mxu1  ;;  %2875 = vmatprep.mubr.msk.bf16.mxu1 %vm1729_vm6, %v3703_v63 }
 0x249   : > { %v1420_v11 = vadd.f32 %v3602_v26, %v1419_v10  ;;  %v3044_v12 = vpop.f32.mrb[54].mxu1 }
 0x24a   : > { %3109 = vmatprep.mubr.msk.bf16.mxu0 %vm1729_vm6, %v1682_v8  ;;  %v1584_v13 = vmul.f32 0.01, %v1428_v9  ;;  %v1431_v14 = vadd.f32 %v3044_v12, %v3602_v26  ;;  %v1422_v15 = vpop.f32.mrb[55].mxu1  ;;  %vm1520_vm10 = vcmp.gt.f32.partialorder %v1428_v9, 0.0 }
 0x24b   : > { %3110 = vmatmul.mubr.msk.bf16.gmra.mrb[112].mxu0 %vm1729_vm6, %v1683_v5  ;;  %v1582_v16 = vmul.f32 0.01, %v1420_v11  ;;  %v1423_v17 = vadd.f32 %v3602_v26, %v1422_v15  ;;  %vm1518_vm11 = vcmp.gt.f32.partialorder %v1420_v11, 0.0 }
 0x24c   : > { %vm1521_vm12 = vcmp.gt.f32.partialorder %v1431_v14, 0.0  ;;  %v1585_v18 = vmul.f32 0.01, %v1431_v14  ;;  %v1648_v20 = vsel %vm1520_vm10, %v1428_v9, %v1584_v13 }
 0x24d   : > { %vm1519_vm13 = vcmp.gt.f32.partialorder %v1423_v17, 0.0  ;;  %v1583_v19 = vmul.f32 0.01, %v1423_v17  ;;  %v1646_v22 = vsel %vm1518_vm11, %v1420_v11, %v1582_v16 }
 0x24e   : > { %v1649_v21 = vsel %vm1521_vm12, %v1431_v14, %v1585_v18 }
 0x24f   : > { %v1685_v23 = vpack.c.bf16 %v1649_v21, %v1648_v20  ;;  %v1647_v24 = vsel %vm1519_vm13, %v1423_v17, %v1583_v19  ;;  %v3047_v25 = vpop.f32.mrb[56].mxu1 }
 0x250   : > { %v1684_v27 = vpack.c.bf16 %v1647_v24, %v1646_v22  ;;  %v1444_v49 = vadd.f32 %v3047_v25, %v3602_v26  ;;  %v1435_v28 = vpop.f32.mrb[57].mxu1 }
 0x251   : > { %v1436_v29 = vadd.f32 %v3602_v26, %v1435_v28  ;;  %v3048_v30 = vpop.f32.mrb[58].mxu1 }
 0x252   : > { %3113 = vmatprep.mubr.msk.bf16.mxu0 %vm1729_vm6, %v1684_v27  ;;  %vm1524_vm14 = vcmp.gt.f32.partialorder %v1444_v49, 0.0  ;;  %v1588_v31 = vmul.f32 0.01, %v1444_v49  ;;  %v1447_v32 = vadd.f32 %v3048_v30, %v3602_v26  ;;  %v1438_v33 = vpop.f32.mrb[59].mxu1 }
 0x253   : > { %3114 = vmatmul.mubr.msk.bf16.gmra.mrb[116].mxu0 %vm1729_vm6, %v1685_v23  ;;  %vm1522_vm15 = vcmp.gt.f32.partialorder %v1436_v29, 0.0  ;;  %v1586_v34 = vmul.f32 0.01, %v1436_v29  ;;  %v1439_v35 = vadd.f32 %v3602_v26, %v1438_v33 }
 0x254   : > { %v1652_v36 = vsel %vm1524_vm14, %v1444_v49, %v1588_v31  ;;  %vm1525_vm0 = vcmp.gt.f32.partialorder %v1447_v32, 0.0  ;;  %v1589_v37 = vmul.f32 0.01, %v1447_v32 }
 0x255   : > { %v1650_v38 = vsel %vm1522_vm15, %v1436_v29, %v1586_v34  ;;  %vm1523_vm1 = vcmp.gt.f32.partialorder %v1439_v35, 0.0  ;;  %v1587_v39 = vmul.f32 0.01, %v1439_v35 }
 0x256   : > { %v1653_v40 = vsel %vm1525_vm0, %v1447_v32, %v1589_v37 }
 0x257   : > { %v1687_v41 = vpack.c.bf16 %v1653_v40, %v1652_v36  ;;  %v1651_v42 = vsel %vm1523_vm1, %v1439_v35, %v1587_v39  ;;  %v3051_v43 = vpop.f32.mrb[60].mxu1 }
 0x258   : > { %v1686_v44 = vpack.c.bf16 %v1651_v42, %v1650_v38  ;;  %v1460_v45 = vadd.f32 %v3051_v43, %v3602_v26  ;;  %v1451_v46 = vpop.f32.mrb[61].mxu1 }
 0x259   : > { %v1452_v47 = vadd.f32 %v3602_v26, %v1451_v46  ;;  %v3052_v48 = vpop.f32.mrb[62].mxu1 }
 0x25a   : > { %3117 = vmatprep.mubr.msk.bf16.mxu0 %vm1729_vm6, %v1686_v44  ;;  %vm1528_vm2 = vcmp.gt.f32.partialorder %v1460_v45, 0.0  ;;  %v1592_v50 = vmul.f32 0.01, %v1460_v45  ;;  %v1463_v51 = vadd.f32 %v3052_v48, %v3602_v26  ;;  %v1454_v52 = vpop.f32.mrb[63].mxu1 }
 0x25b   : > { %3118 = vmatmul.mubr.msk.bf16.gmra.mrb[120].mxu0 %vm1729_vm6, %v1687_v41  ;;  %vm1526_vm3 = vcmp.gt.f32.partialorder %v1452_v47, 0.0  ;;  %v1590_v53 = vmul.f32 0.01, %v1452_v47  ;;  %v1455_v54 = vadd.f32 %v3602_v26, %v1454_v52  ;;  %v3710_v26 = vld [vmem:[%s4038_s6] ss:$0 sm:$0xff] }
 0x25c   : > { %v1656_v55 = vsel %vm1528_vm2, %v1460_v45, %v1592_v50  ;;  %vm1529_vm4 = vcmp.gt.f32.partialorder %v1463_v51, 0.0  ;;  %v1593_v56 = vmul.f32 0.01, %v1463_v51 }
 0x25d   : > { %v1654_v57 = vsel %vm1526_vm3, %v1452_v47, %v1590_v53  ;;  %vm1527_vm5 = vcmp.gt.f32.partialorder %v1455_v54, 0.0  ;;  %v1591_v58 = vmul.f32 0.01, %v1455_v54 }
 0x25e   : > { %v1657_v59 = vsel %vm1529_vm4, %v1463_v51, %v1593_v56 }
 0x25f   : > { %v1689_v60 = vpack.c.bf16 %v1657_v59, %v1656_v55  ;;  %v1655_v61 = vsel %vm1527_vm5, %v1455_v54, %v1591_v58 }
 0x260   : > { %v1688_v62 = vpack.c.bf16 %v1655_v61, %v1654_v57 }
 0x262   : > { %3121 = vmatprep.mubr.msk.bf16.mxu0 %vm1729_vm6, %v1688_v62 }
 0x263   : > { %3122 = vmatmul.mubr.msk.bf16.gmra.mrb[124].mxu0 %vm1729_vm6, %v1689_v60 }
 0x2be   : > { %v3063_v0 = vpop.f32.mrb[64].mxu0 }
 0x2bf   : > { %v1869_v1 = vadd.f32 %v3063_v0, %v3710_v26  ;;  %v1860_v2 = vpop.f32.mrb[65].mxu0 }
 0x2c0   : > { %v1861_v3 = vadd.f32 %v3710_v26, %v1860_v2  ;;  %v3064_v4 = vpop.f32.mrb[66].mxu0 }
 0x2c1   : > { %v2181_v5 = vmul.f32 0.01, %v1869_v1  ;;  %v1872_v6 = vadd.f32 %v3064_v4, %v3710_v26  ;;  %v1863_v7 = vpop.f32.mrb[67].mxu0  ;;  %vm2117_vm7 = vcmp.gt.f32.partialorder %v1869_v1, 0.0 }
 0x2c2   : > { %v2179_v8 = vmul.f32 0.01, %v1861_v3  ;;  %v1864_v9 = vadd.f32 %v3710_v26, %v1863_v7  ;;  %vm2115_vm8 = vcmp.gt.f32.partialorder %v1861_v3, 0.0 }
 0x2c3   : > { %vm2118_vm9 = vcmp.gt.f32.partialorder %v1872_v6, 0.0  ;;  %v2182_v10 = vmul.f32 0.01, %v1872_v6  ;;  %v3716_v12 = vsel %vm2117_vm7, %v1869_v1, %v2181_v5 }
 0x2c4   : > { %vm2116_vm10 = vcmp.gt.f32.partialorder %v1864_v9, 0.0  ;;  %v2180_v11 = vmul.f32 0.01, %v1864_v9  ;;  %v3720_v14 = vsel %vm2115_vm8, %v1861_v3, %v2179_v8 }
 0x2c5   : > { %v3718_v13 = vsel %vm2118_vm9, %v1872_v6, %v2182_v10 }
 0x2c6   : > { %v3722_v15 = vsel %vm2116_vm10, %v1864_v9, %v2180_v11  ;;  %v3067_v16 = vpop.f32.mrb[68].mxu0  ;;  %v2309_v17 = vpack.c.bf16 %v3718_v13, %v3716_v12 }
 0x2c7   : > { %v1885_v18 = vadd.f32 %v3067_v16, %v3710_v26  ;;  %v1876_v19 = vpop.f32.mrb[69].mxu0  ;;  %v2308_v20 = vpack.c.bf16 %v3722_v15, %v3720_v14 }
 0x2c8   : > { %v1877_v21 = vadd.f32 %v3710_v26, %v1876_v19  ;;  %v3068_v22 = vpop.f32.mrb[70].mxu0 }
 0x2c9   : > { %v2185_v23 = vmul.f32 0.01, %v1885_v18  ;;  %v1888_v24 = vadd.f32 %v3068_v22, %v3710_v26  ;;  %v1879_v25 = vpop.f32.mrb[71].mxu0  ;;  %vm2121_vm11 = vcmp.gt.f32.partialorder %v1885_v18, 0.0 }
 0x2ca   : > { %v2183_v27 = vmul.f32 0.01, %v1877_v21  ;;  %v1880_v49 = vadd.f32 %v3710_v26, %v1879_v25  ;;  %vm2119_vm12 = vcmp.gt.f32.partialorder %v1877_v21, 0.0 }
 0x2cb   : > { %vm2122_vm13 = vcmp.gt.f32.partialorder %v1888_v24, 0.0  ;;  %v2186_v28 = vmul.f32 0.01, %v1888_v24  ;;  %v3732_v30 = vsel %vm2121_vm11, %v1885_v18, %v2185_v23 }
 0x2cc   : > { %vm2120_vm14 = vcmp.gt.f32.partialorder %v1880_v49, 0.0  ;;  %v2184_v29 = vmul.f32 0.01, %v1880_v49  ;;  %v3736_v32 = vsel %vm2119_vm12, %v1877_v21, %v2183_v27 }
 0x2cd   : > { %v3734_v31 = vsel %vm2122_vm13, %v1888_v24, %v2186_v28 }
 0x2ce   : > { %v3738_v33 = vsel %vm2120_vm14, %v1880_v49, %v2184_v29  ;;  %v3071_v34 = vpop.f32.mrb[72].mxu0  ;;  %v2311_v35 = vpack.c.bf16 %v3734_v31, %v3732_v30 }
 0x2cf   : > { %v1901_v36 = vadd.f32 %v3071_v34, %v3710_v26  ;;  %v1892_v37 = vpop.f32.mrb[73].mxu0  ;;  %v2310_v38 = vpack.c.bf16 %v3738_v33, %v3736_v32 }
 0x2d0   : > { %v1893_v39 = vadd.f32 %v3710_v26, %v1892_v37  ;;  %v3072_v40 = vpop.f32.mrb[74].mxu0 }
 0x2d1   : > { %v2189_v41 = vmul.f32 0.01, %v1901_v36  ;;  %v1904_v42 = vadd.f32 %v3072_v40, %v3710_v26  ;;  %v1895_v43 = vpop.f32.mrb[75].mxu0  ;;  %vm2125_vm15 = vcmp.gt.f32.partialorder %v1901_v36, 0.0 }
 0x2d2   : > { %v2187_v44 = vmul.f32 0.01, %v1893_v39  ;;  %v1896_v45 = vadd.f32 %v3710_v26, %v1895_v43  ;;  %vm2123_vm0 = vcmp.gt.f32.partialorder %v1893_v39, 0.0 }
 0x2d3   : > { %vm2126_vm1 = vcmp.gt.f32.partialorder %v1904_v42, 0.0  ;;  %v2190_v46 = vmul.f32 0.01, %v1904_v42  ;;  %v3748_v48 = vsel %vm2125_vm15, %v1901_v36, %v2189_v41 }
 0x2d4   : > { %vm2124_vm2 = vcmp.gt.f32.partialorder %v1896_v45, 0.0  ;;  %v2188_v47 = vmul.f32 0.01, %v1896_v45  ;;  %v3752_v51 = vsel %vm2123_vm0, %v1893_v39, %v2187_v44 }
 0x2d5   : > { %v3750_v50 = vsel %vm2126_vm1, %v1904_v42, %v2190_v46 }
 0x2d6   : > { %v3754_v52 = vsel %vm2124_vm2, %v1896_v45, %v2188_v47  ;;  %v3075_v53 = vpop.f32.mrb[76].mxu0  ;;  %v2313_v54 = vpack.c.bf16 %v3750_v50, %v3748_v48  ;;  %v2344_v45 = vsel %vm1729_vm6, %v2308_v20, 0 }
 0x2d7   : > { %v1917_v55 = vadd.f32 %v3075_v53, %v3710_v26  ;;  %v1908_v56 = vpop.f32.mrb[77].mxu0  ;;  %v2312_v57 = vpack.c.bf16 %v3754_v52, %v3752_v51 }
 0x2d8   : > { %v1909_v58 = vadd.f32 %v3710_v26, %v1908_v56  ;;  %v3076_v59 = vpop.f32.mrb[78].mxu0 }
 0x2d9   : > { %v2193_v60 = vmul.f32 0.01, %v1917_v55  ;;  %v1920_v61 = vadd.f32 %v3076_v59, %v3710_v26  ;;  %v1911_v62 = vpop.f32.mrb[79].mxu0  ;;  %vm2129_vm3 = vcmp.gt.f32.partialorder %v1917_v55, 0.0  ;;  %v2521_v59 = vld [vmem:[#allocation2] sm:$0x1] }
 0x2da   : > { %v2191_v0 = vmul.f32 0.01, %v1909_v58  ;;  %v1912_v1 = vadd.f32 %v3710_v26, %v1911_v62  ;;  %vm2127_vm4 = vcmp.gt.f32.partialorder %v1909_v58, 0.0 }
 0x2db   : > { %vm2130_vm5 = vcmp.gt.f32.partialorder %v1920_v61, 0.0  ;;  %v2194_v2 = vmul.f32 0.01, %v1920_v61  ;;  %v3764_v4 = vsel %vm2129_vm3, %v1917_v55, %v2193_v60 }
 0x2dc   : > { %vm2128_vm7 = vcmp.gt.f32.partialorder %v1912_v1, 0.0  ;;  %v2192_v3 = vmul.f32 0.01, %v1912_v1  ;;  %v3768_v6 = vsel %vm2127_vm4, %v1909_v58, %v2191_v0  ;;  %v3267_v58 = vmov 0  }
 0x2dd   : > { %v3766_v5 = vsel %vm2130_vm5, %v1920_v61, %v2194_v2  ;;  %3183 = vset.pattern.permute.xlu0 %v3267_v58 }
 0x2de   : > { %v3770_v7 = vsel %vm2128_vm7, %v1912_v1, %v2192_v3  ;;  %v3079_v8 = vpop.f32.mrb[80].mxu0  ;;  %v2315_v9 = vpack.c.bf16 %v3766_v5, %v3764_v4  ;;  %2524 = vperm.xlu0 %3183, %v2521_v59  }
 0x2df   : > { %v1933_v10 = vadd.f32 %v3079_v8, %v3710_v26  ;;  %v1924_v11 = vpop.f32.mrb[81].mxu0  ;;  %v2314_v16 = vpack.c.bf16 %v3770_v7, %v3768_v6 }
 0x2e0   : > { %v1925_v18 = vadd.f32 %v3710_v26, %v1924_v11  ;;  %v3080_v19 = vpop.f32.mrb[82].mxu0 }
 0x2e1   : > { %v2197_v21 = vmul.f32 0.01, %v1933_v10  ;;  %v1936_v22 = vadd.f32 %v3080_v19, %v3710_v26  ;;  %v1927_v23 = vpop.f32.mrb[83].mxu0  ;;  %vm2133_vm8 = vcmp.gt.f32.partialorder %v1933_v10, 0.0 }
 0x2e2   : > { %v2195_v24 = vmul.f32 0.01, %v1925_v18  ;;  %v1928_v25 = vadd.f32 %v3710_v26, %v1927_v23  ;;  %vm2131_vm9 = vcmp.gt.f32.partialorder %v1925_v18, 0.0 }
 0x2e3   : > { %vm2134_vm10 = vcmp.gt.f32.partialorder %v1936_v22, 0.0  ;;  %v2198_v27 = vmul.f32 0.01, %v1936_v22  ;;  %v2261_v28 = vsel %vm2133_vm8, %v1933_v10, %v2197_v21 }
 0x2e4   : > { %vm2132_vm11 = vcmp.gt.f32.partialorder %v1928_v25, 0.0  ;;  %v2196_v49 = vmul.f32 0.01, %v1928_v25  ;;  %v2259_v34 = vsel %vm2131_vm9, %v1925_v18, %v2195_v24  ;;  %v2347_v18 = vsel %vm1729_vm6, %v2309_v17, 0 }
 0x2e5   : > { %v2262_v29 = vsel %vm2134_vm10, %v1936_v22, %v2198_v27 }
 0x2e6   : > { %v2317_v36 = vpack.c.bf16 %v2262_v29, %v2261_v28  ;;  %v2260_v37 = vsel %vm2132_vm11, %v1928_v25, %v2196_v49  ;;  %v3083_v39 = vpop.f32.mrb[84].mxu0 }
 0x2e7   : > { %v2316_v40 = vpack.c.bf16 %v2260_v37, %v2259_v34  ;;  %v1949_v41 = vadd.f32 %v3083_v39, %v3710_v26  ;;  %v1940_v42 = vpop.f32.mrb[85].mxu0 }
 0x2e8   : > { %v1941_v43 = vadd.f32 %v3710_v26, %v1940_v42  ;;  %v3084_v44 = vpop.f32.mrb[86].mxu0 }
 0x2e9   : > { %3126 = vmatprep.subr.msk.bf16.mxu1 %vm1729_vm6, %v2316_v40  ;;  %v2201_v46 = vmul.f32 0.01, %v1949_v41  ;;  %v1952_v47 = vadd.f32 %v3084_v44, %v3710_v26  ;;  %v1943_v53 = vpop.f32.mrb[87].mxu0  ;;  %vm2137_vm12 = vcmp.gt.f32.partialorder %v1949_v41, 0.0 }
 0x2ea   : > { %2860 = vmatpush3.bf16.xpose.msra.mxu1 %v2344_v45  ;;  %v2199_v55 = vmul.f32 0.01, %v1941_v43  ;;  %v1944_v56 = vadd.f32 %v3710_v26, %v1943_v53  ;;  %vm2135_vm13 = vcmp.gt.f32.partialorder %v1941_v43, 0.0 }
 0x2eb   : > { %3127 = vmatprep.subr.msk.bf16.mxu1 %vm1729_vm6, %v2317_v36  ;;  %vm2138_vm14 = vcmp.gt.f32.partialorder %v1952_v47, 0.0  ;;  %v2202_v60 = vmul.f32 0.01, %v1952_v47  ;;  %v2265_v15 = vsel %vm2137_vm12, %v1949_v41, %v2201_v46  ;;  %v2350_v41 = vsel %vm1729_vm6, %v2310_v38, 0 }
 0x2ec   : > { %vm2136_vm15 = vcmp.gt.f32.partialorder %v1944_v56, 0.0  ;;  %v2200_v14 = vmul.f32 0.01, %v1944_v56  ;;  %v2263_v61 = vsel %vm2135_vm13, %v1941_v43, %v2199_v55 }
 0x2ed   : > { %v2266_v20 = vsel %vm2138_vm14, %v1952_v47, %v2202_v60 }
 0x2ee   : > { %v2319_v62 = vpack.c.bf16 %v2266_v20, %v2265_v15  ;;  %v2264_v0 = vsel %vm2136_vm15, %v1944_v56, %v2200_v14  ;;  %v3087_v1 = vpop.f32.mrb[88].mxu0 }
 0x2ef   : > { %v2318_v2 = vpack.c.bf16 %v2264_v0, %v2263_v61  ;;  %v1965_v3 = vadd.f32 %v3087_v1, %v3710_v26  ;;  %v1956_v8 = vpop.f32.mrb[89].mxu0  ;;  %v2353_v61 = vsel %vm1729_vm6, %v2311_v35, 0 }
 0x2f0   : > { %v1957_v10 = vadd.f32 %v3710_v26, %v1956_v8  ;;  %v3088_v11 = vpop.f32.mrb[90].mxu0 }
 0x2f1   : > { %v2205_v19 = vmul.f32 0.01, %v1965_v3  ;;  %v1968_v21 = vadd.f32 %v3088_v11, %v3710_v26  ;;  %v1959_v22 = vpop.f32.mrb[91].mxu0  ;;  %vm2141_vm0 = vcmp.gt.f32.partialorder %v1965_v3, 0.0 }
 0x2f2   : > { %2862 = vmatpush3.bf16.xpose.msra.mxu1 %v2347_v18  ;;  %v2203_v23 = vmul.f32 0.01, %v1957_v10  ;;  %v1960_v24 = vadd.f32 %v3710_v26, %v1959_v22  ;;  %vm2139_vm1 = vcmp.gt.f32.partialorder %v1957_v10, 0.0 }
 0x2f3   : > { %3128 = vmatprep.subr.msk.bf16.mxu1 %vm1729_vm6, %v2318_v2  ;;  %vm2142_vm2 = vcmp.gt.f32.partialorder %v1968_v21, 0.0  ;;  %v2206_v25 = vmul.f32 0.01, %v1968_v21  ;;  %v3799_v49 = vsel %vm2141_vm0, %v1965_v3, %v2205_v19 }
 0x2f4   : > { %vm2140_vm3 = vcmp.gt.f32.partialorder %v1960_v24, 0.0  ;;  %v2204_v27 = vmul.f32 0.01, %v1960_v24  ;;  %v2267_v13 = vsel %vm2139_vm1, %v1957_v10, %v2203_v23 }
 0x2f5   : > { %v3801_v12 = vsel %vm2142_vm2, %v1968_v21, %v2206_v25 }
 0x2f6   : > { %v2321_v17 = vpack.c.bf16 %v3801_v12, %v3799_v49  ;;  %v2268_v28 = vsel %vm2140_vm3, %v1960_v24, %v2204_v27  ;;  %v3091_v29 = vpop.f32.mrb[92].mxu0  ;;  %v2356_v27 = vsel %vm1729_vm6, %v2312_v57, 0 }
 0x2f7   : > { %v2320_v34 = vpack.c.bf16 %v2268_v28, %v2267_v13  ;;  %v1981_v36 = vadd.f32 %v3091_v29, %v3710_v26  ;;  %v1972_v37 = vpop.f32.mrb[93].mxu0 }
 0x2f8   : > { %v1973_v39 = vadd.f32 %v3710_v26, %v1972_v37  ;;  %v3092_v40 = vpop.f32.mrb[94].mxu0 }
 0x2f9   : > { %v2209_v42 = vmul.f32 0.01, %v1981_v36  ;;  %v1984_v43 = vadd.f32 %v3092_v40, %v3710_v26  ;;  %v1975_v44 = vpop.f32.mrb[95].mxu0  ;;  %vm2145_vm4 = vcmp.gt.f32.partialorder %v1981_v36, 0.0 }
 0x2fa   : > { %2864 = vmatpush3.bf16.xpose.msra.mxu1 %v2350_v41  ;;  %v2207_v45 = vmul.f32 0.01, %v1973_v39  ;;  %v1976_v46 = vadd.f32 %v3710_v26, %v1975_v44  ;;  %vm2143_vm5 = vcmp.gt.f32.partialorder %v1973_v39, 0.0 }
 0x2fb   : > { %3129 = vmatprep.subr.msk.bf16.mxu1 %vm1729_vm6, %v2319_v62  ;;  %vm2146_vm7 = vcmp.gt.f32.partialorder %v1984_v43, 0.0  ;;  %v2210_v47 = vmul.f32 0.01, %v1984_v43  ;;  %v3814_v55 = vsel %vm2145_vm4, %v1981_v36, %v2209_v42 }
 0x2fc   : > { %vm2144_vm8 = vcmp.gt.f32.partialorder %v1976_v46, 0.0  ;;  %v2208_v53 = vmul.f32 0.01, %v1976_v46  ;;  %v3818_v33 = vsel %vm2143_vm5, %v1973_v39, %v2207_v45  ;;  %v2359_v45 = vsel %vm1729_vm6, %v2313_v54, 0 }
 0x2fd   : > { %v3816_v32 = vsel %vm2146_vm7, %v1984_v43, %v2210_v47 }
 0x2fe   : > { %v2323_v38 = vpack.c.bf16 %v3816_v32, %v3814_v55  ;;  %v3822_v56 = vsel %vm2144_vm8, %v1976_v46, %v2208_v53  ;;  %v3095_v58 = vpop.f32.mrb[96].mxu0 }
 0x2ff   : > { %v2322_v59 = vpack.c.bf16 %v3822_v56, %v3818_v33  ;;  %v1997_v60 = vadd.f32 %v3095_v58, %v3710_v26  ;;  %v1988_v14 = vpop.f32.mrb[97].mxu0 }
 0x300   : > { %v1989_v15 = vadd.f32 %v3710_v26, %v1988_v14  ;;  %v3096_v20 = vpop.f32.mrb[98].mxu0 }
 0x301   : > { %v2213_v62 = vmul.f32 0.01, %v1997_v60  ;;  %v2000_v0 = vadd.f32 %v3096_v20, %v3710_v26  ;;  %v1991_v1 = vpop.f32.mrb[99].mxu0  ;;  %vm2149_vm9 = vcmp.gt.f32.partialorder %v1997_v60, 0.0 }
 0x302   : > { %2866 = vmatpush3.bf16.xpose.msra.mxu1 %v2353_v61  ;;  %v2211_v2 = vmul.f32 0.01, %v1989_v15  ;;  %v1992_v3 = vadd.f32 %v3710_v26, %v1991_v1  ;;  %vm2147_vm10 = vcmp.gt.f32.partialorder %v1989_v15, 0.0 }
 0x303   : > { %3130 = vmatprep.subr.msk.bf16.mxu1 %vm1729_vm6, %v2320_v34  ;;  %vm2150_vm11 = vcmp.gt.f32.partialorder %v2000_v0, 0.0  ;;  %v2214_v8 = vmul.f32 0.01, %v2000_v0  ;;  %v3835_v11 = vsel %vm2149_vm9, %v1997_v60, %v2213_v62 }
 0x304   : > { %vm2148_vm12 = vcmp.gt.f32.partialorder %v1992_v3, 0.0  ;;  %v2212_v10 = vmul.f32 0.01, %v1992_v3  ;;  %v3839_v31 = vsel %vm2147_vm10, %v1989_v15, %v2211_v2 }
 0x305   : > { %v3837_v30 = vsel %vm2150_vm11, %v2000_v0, %v2214_v8 }
 0x306   : > { %v3841_v35 = vsel %vm2148_vm12, %v1992_v3, %v2212_v10  ;;  %v3099_v18 = vpop.f32.mrb[100].mxu0  ;;  %v2325_v19 = vpack.c.bf16 %v3837_v30, %v3835_v11  ;;  %v2362_v3 = vsel %vm1729_vm6, %v2314_v16, 0 }
 0x307   : > { %v2013_v21 = vadd.f32 %v3099_v18, %v3710_v26  ;;  %v2004_v22 = vpop.f32.mrb[101].mxu0  ;;  %v2324_v23 = vpack.c.bf16 %v3841_v35, %v3839_v31 }
 0x308   : > { %v2005_v24 = vadd.f32 %v3710_v26, %v2004_v22  ;;  %v3100_v25 = vpop.f32.mrb[102].mxu0 }
 0x309   : > { %v2217_v13 = vmul.f32 0.01, %v2013_v21  ;;  %v2016_v28 = vadd.f32 %v3100_v25, %v3710_v26  ;;  %v2007_v29 = vpop.f32.mrb[103].mxu0  ;;  %vm2153_vm13 = vcmp.gt.f32.partialorder %v2013_v21, 0.0 }
 0x30a   : > { %2868 = vmatpush3.bf16.xpose.msra.mxu1 %v2356_v27  ;;  %v2215_v34 = vmul.f32 0.01, %v2005_v24  ;;  %v2008_v36 = vadd.f32 %v3710_v26, %v2007_v29  ;;  %vm2151_vm14 = vcmp.gt.f32.partialorder %v2005_v24, 0.0 }
 0x30b   : > { %3131 = vmatprep.subr.msk.bf16.mxu1 %vm1729_vm6, %v2321_v17  ;;  %vm2154_vm15 = vcmp.gt.f32.partialorder %v2016_v28, 0.0  ;;  %v2218_v37 = vmul.f32 0.01, %v2016_v28  ;;  %v3859_v52 = vsel %vm2153_vm13, %v2013_v21, %v2217_v13 }
 0x30c   : > { %vm2152_vm0 = vcmp.gt.f32.partialorder %v2008_v36, 0.0  ;;  %v2216_v51 = vmul.f32 0.01, %v2008_v36  ;;  %v3863_v39 = vsel %vm2151_vm14, %v2005_v24, %v2215_v34 }
 0x30d   : > { %v3861_v57 = vsel %vm2154_vm15, %v2016_v28, %v2218_v37 }
 0x30e   : > { %v3865_v40 = vsel %vm2152_vm0, %v2008_v36, %v2216_v51  ;;  %v3103_v41 = vpop.f32.mrb[104].mxu0  ;;  %v2327_v42 = vpack.c.bf16 %v3861_v57, %v3859_v52  ;;  %v2365_v51 = vsel %vm1729_vm6, %v2315_v9, 0 }
 0x30f   : > { %v2029_v49 = vadd.f32 %v3103_v41, %v3710_v26  ;;  %v2020_v12 = vpop.f32.mrb[105].mxu0  ;;  %v2326_v17 = vpack.c.bf16 %v3865_v40, %v3863_v39 }
 0x310   : > { %v2021_v43 = vadd.f32 %v3710_v26, %v2020_v12  ;;  %v3104_v44 = vpop.f32.mrb[106].mxu0 }
 0x311   : > { %v2221_v46 = vmul.f32 0.01, %v2029_v49  ;;  %v2032_v47 = vadd.f32 %v3104_v44, %v3710_v26  ;;  %v2023_v53 = vpop.f32.mrb[107].mxu0  ;;  %vm2157_vm1 = vcmp.gt.f32.partialorder %v2029_v49, 0.0 }
 0x312   : > { %2870 = vmatpush3.bf16.xpose.msra.mxu1 %v2359_v45  ;;  %v2219_v58 = vmul.f32 0.01, %v2021_v43  ;;  %v2024_v60 = vadd.f32 %v3710_v26, %v2023_v53  ;;  %vm2155_vm2 = vcmp.gt.f32.partialorder %v2021_v43, 0.0 }
 0x313   : > { %vm2158_vm3 = vcmp.gt.f32.partialorder %v2032_v47, 0.0  ;;  %v2222_v14 = vmul.f32 0.01, %v2032_v47  ;;  %3132 = vmatprep.subr.msk.bf16.mxu1 %vm1729_vm6, %v2322_v59  ;;  %v3883_v50 = vsel %vm2157_vm1, %v2029_v49, %v2221_v46 }
 0x314   : > { %vm2156_vm4 = vcmp.gt.f32.partialorder %v2024_v60, 0.0  ;;  %v2220_v48 = vmul.f32 0.01, %v2024_v60  ;;  %v3887_v15 = vsel %vm2155_vm2, %v2021_v43, %v2219_v58 }
 0x315   : > { %v3885_v54 = vsel %vm2158_vm3, %v2032_v47, %v2222_v14 }
 0x316   : > { %v3889_v20 = vsel %vm2156_vm4, %v2024_v60, %v2220_v48  ;;  %v3107_v61 = vpop.f32.mrb[108].mxu0  ;;  %v2329_v62 = vpack.c.bf16 %v3885_v54, %v3883_v50  ;;  %v2392_v48 = vsel %vm1729_vm6, %v2324_v23, 0 }
 0x317   : > { %v2045_v0 = vadd.f32 %v3107_v61, %v3710_v26  ;;  %v2036_v1 = vpop.f32.mrb[109].mxu0  ;;  %v2328_v33 = vpack.c.bf16 %v3889_v20, %v3887_v15 }
 0x318   : > { %v2037_v56 = vadd.f32 %v3710_v26, %v2036_v1  ;;  %v3108_v59 = vpop.f32.mrb[110].mxu0 }
 0x319   : > { %v2225_v2 = vmul.f32 0.01, %v2045_v0  ;;  %v2048_v8 = vadd.f32 %v3108_v59, %v3710_v26  ;;  %v2039_v10 = vpop.f32.mrb[111].mxu0  ;;  %vm2161_vm5 = vcmp.gt.f32.partialorder %v2045_v0, 0.0 }
 0x31a   : > { %2872 = vmatpush3.bf16.xpose.msra.mxu1 %v2362_v3  ;;  %v2223_v18 = vmul.f32 0.01, %v2037_v56  ;;  %v2040_v21 = vadd.f32 %v3710_v26, %v2039_v10  ;;  %vm2159_vm7 = vcmp.gt.f32.partialorder %v2037_v56, 0.0 }
 0x31b   : > { %vm2162_vm8 = vcmp.gt.f32.partialorder %v2048_v8, 0.0  ;;  %v2226_v22 = vmul.f32 0.01, %v2048_v8  ;;  %3133 = vmatprep.subr.msk.bf16.mxu1 %vm1729_vm6, %v2323_v38  ;;  %v3907_v7 = vsel %vm2161_vm5, %v2045_v0, %v2225_v2 }
 0x31c   : > { %vm2160_vm9 = vcmp.gt.f32.partialorder %v2040_v21, 0.0  ;;  %v2224_v6 = vmul.f32 0.01, %v2040_v21  ;;  %v3911_v24 = vsel %vm2159_vm7, %v2037_v56, %v2223_v18 }
 0x31d   : > { %v3909_v16 = vsel %vm2162_vm8, %v2048_v8, %v2226_v22 }
 0x31e   : > { %v3913_v25 = vsel %vm2160_vm9, %v2040_v21, %v2224_v6  ;;  %v3111_v27 = vpop.f32.mrb[112].mxu0  ;;  %v2331_v13 = vpack.c.bf16 %v3909_v16, %v3907_v7  ;;  %v3268_v7 = vmov 1966171168  }
 0x31f   : > { %v2061_v28 = vadd.f32 %v3111_v27, %v3710_v26  ;;  %v2052_v29 = vpop.f32.mrb[113].mxu0  ;;  %v2330_v55 = vpack.c.bf16 %v3913_v25, %v3911_v24  ;;  %v2542_v16 = vunpack.c.l.s4 %v3268_v7 }
 0x320   : > { %v2053_v32 = vadd.f32 %v3710_v26, %v2052_v29  ;;  %v3112_v38 = vpop.f32.mrb[114].mxu0  ;;  %v2395_v29 = vsel %vm1729_vm6, %v2325_v19, 0  ;;  %v2413_v57 = vsel %vm1729_vm6, %v2331_v13, 0 }
 0x321   : > { %v2229_v34 = vmul.f32 0.01, %v2061_v28  ;;  %v2064_v36 = vadd.f32 %v3112_v38, %v3710_v26  ;;  %v2055_v37 = vpop.f32.mrb[115].mxu0  ;;  %vm2165_vm10 = vcmp.gt.f32.partialorder %v2061_v28, 0.0  ;;  %v2410_v52 = vsel %vm1729_vm6, %v2330_v55, 0 }
 0x322   : > { %v2227_v41 = vmul.f32 0.01, %v2053_v32  ;;  %v2056_v49 = vadd.f32 %v3710_v26, %v2055_v37  ;;  %2874 = vmatpush3.bf16.xpose.msra.mxu1 %v2365_v51  ;;  %vm2163_vm11 = vcmp.gt.f32.partialorder %v2053_v32, 0.0  ;;  %v2543_v13 = vunpack.c.0.s8 %v2542_v16 }
 0x323   : > { %vm2166_vm12 = vcmp.gt.f32.partialorder %v2064_v36, 0.0  ;;  %v2230_v12 = vmul.f32 0.01, %v2064_v36  ;;  %v2293_v44 = vsel %vm2165_vm10, %v2061_v28, %v2229_v34 }
 0x324   : > { %vm2164_vm13 = vcmp.gt.f32.partialorder %v2056_v49, 0.0  ;;  %v2228_v43 = vmul.f32 0.01, %v2056_v49  ;;  %v2291_v46 = vsel %vm2163_vm11, %v2053_v32, %v2227_v41 }
 0x325   : > { %v2294_v45 = vsel %vm2166_vm12, %v2064_v36, %v2230_v12 }
 0x326   : > { %v2333_v47 = vpack.c.bf16 %v2294_v45, %v2293_v44  ;;  %v2292_v53 = vsel %vm2164_vm13, %v2056_v49, %v2228_v43  ;;  %v3115_v58 = vpop.f32.mrb[116].mxu0 }
 0x327   : > { %v2332_v60 = vpack.c.bf16 %v2292_v53, %v2291_v46  ;;  %v2077_v4 = vadd.f32 %v3115_v58, %v3710_v26  ;;  %v2068_v5 = vpop.f32.mrb[117].mxu0  ;;  %v2398_v58 = vsel %vm1729_vm6, %v2326_v17, 0 }
 0x328   : > { %v2069_v9 = vadd.f32 %v3710_v26, %v2068_v5  ;;  %v3116_v14 = vpop.f32.mrb[118].mxu0 }
 0x329   : > { %3134 = vmatprep.subr.msk.bf16.mxu1 %vm1729_vm6, %v2332_v60  ;;  %2876 = vmatmul.mubr.msk.bf16.vlgmr.msra.gmra.mrb[64].mxu1 %vm1729_vm6, %v3703_v63  ;;  %v2233_v61 = vmul.f32 0.01, %v2077_v4  ;;  %v2080_v0 = vadd.f32 %v3116_v14, %v3710_v26  ;;  %v2071_v1 = vpop.f32.mrb[119].mxu0  ;;  %vm2169_vm14 = vcmp.gt.f32.partialorder %v2077_v4, 0.0 }
 0x32a   : > { %2878 = vmatpush3.bf16.xpose.msra.mxu1 %v2392_v48  ;;  %v2231_v56 = vmul.f32 0.01, %v2069_v9  ;;  %v2072_v59 = vadd.f32 %v3710_v26, %v2071_v1  ;;  %2893 = vmatprep.mubr.msk.bf16.mxu1 %vm1729_vm6, %v3703_v63  ;;  %vm2167_vm15 = vcmp.gt.f32.partialorder %v2069_v9, 0.0 }
 0x32b   : > { %vm2170_vm0 = vcmp.gt.f32.partialorder %v2080_v0, 0.0  ;;  %v2234_v2 = vmul.f32 0.01, %v2080_v0  ;;  %3135 = vmatprep.subr.msk.bf16.mxu1 %vm1729_vm6, %v2333_v47  ;;  %v2297_v35 = vsel %vm2169_vm14, %v2077_v4, %v2233_v61 }
 0x32c   : > { %vm2168_vm1 = vcmp.gt.f32.partialorder %v2072_v59, 0.0  ;;  %v2232_v31 = vmul.f32 0.01, %v2072_v59  ;;  %v2295_v3 = vsel %vm2167_vm15, %v2069_v9, %v2231_v56 }
 0x32d   : > { %v2298_v23 = vsel %vm2170_vm0, %v2080_v0, %v2234_v2  ;;  %v2407_v2 = vsel %vm1729_vm6, %v2329_v62, 0 }
 0x32e   : > { %v2335_v8 = vpack.c.bf16 %v2298_v23, %v2297_v35  ;;  %v2296_v10 = vsel %vm2168_vm1, %v2072_v59, %v2232_v31  ;;  %v3119_v18 = vpop.f32.mrb[120].mxu0  ;;  %v2401_v59 = vsel %vm1729_vm6, %v2327_v42, 0  ;;  %v2527_v42 = vlaneseq }
 0x32f   : > { %v2334_v21 = vpack.c.bf16 %v2296_v10, %v2295_v3  ;;  %v2093_v22 = vadd.f32 %v3119_v18, %v3710_v26  ;;  %v2084_v6 = vpop.f32.mrb[121].mxu0 }
 0x330   : > { %v2085_v27 = vadd.f32 %v3710_v26, %v2084_v6  ;;  %v3120_v28 = vpop.f32.mrb[122].mxu0  ;;  %v2528_v50 = vshrl.u32 %v2527_v42, 7 }
 0x331   : > { %vm2173_vm2 = vcmp.gt.f32.partialorder %v2093_v22, 0.0  ;;  %v2237_v32 = vmul.f32 0.01, %v2093_v22  ;;  %v2096_v38 = vadd.f32 %v3120_v28, %v3710_v26  ;;  %v2087_v34 = vpop.f32.mrb[123].mxu0 }
 0x332   : > { %2880 = vmatpush3.bf16.xpose.msra.mxu1 %v2395_v29  ;;  %vm2171_vm3 = vcmp.gt.f32.partialorder %v2085_v27, 0.0  ;;  %v2235_v36 = vmul.f32 0.01, %v2085_v27  ;;  %v2088_v37 = vadd.f32 %v3710_v26, %v2087_v34  ;;  %v2529_v54 = vsub.s32 0, %v2528_v50 }
 0x333   : > { %3136 = vmatprep.subr.msk.bf16.mxu1 %vm1729_vm6, %v2334_v21  ;;  %v2301_v51 = vsel %vm2173_vm2, %v2093_v22, %v2237_v32  ;;  %vm2174_vm4 = vcmp.gt.f32.partialorder %v2096_v38, 0.0  ;;  %v2238_v41 = vmul.f32 0.01, %v2096_v38 }
 0x334   : > { %v2299_v49 = vsel %vm2171_vm3, %v2085_v27, %v2235_v36  ;;  %vm2172_vm5 = vcmp.gt.f32.partialorder %v2088_v37, 0.0  ;;  %v2236_v11 = vmul.f32 0.01, %v2088_v37 }
 0x335   : > { %v2302_v30 = vsel %vm2174_vm4, %v2096_v38, %v2238_v41 }
 0x336   : > { %v2337_v19 = vpack.c.bf16 %v2302_v30, %v2301_v51  ;;  %v2300_v12 = vsel %vm2172_vm5, %v2088_v37, %v2236_v11  ;;  %v3123_v43 = vpop.f32.mrb[124].mxu0 }
 0x337   : > { %v2336_v44 = vpack.c.bf16 %v2300_v12, %v2299_v49  ;;  %v2109_v45 = vadd.f32 %v3123_v43, %v3710_v26  ;;  %v2100_v46 = vpop.f32.mrb[125].mxu0 }
 0x338   : > { %v2101_v47 = vadd.f32 %v3710_v26, %v2100_v46  ;;  %v3124_v53 = vpop.f32.mrb[126].mxu0 }
 0x339   : > { %vm2177_vm7 = vcmp.gt.f32.partialorder %v2109_v45, 0.0  ;;  %v2241_v60 = vmul.f32 0.01, %v2109_v45  ;;  %v2112_v4 = vadd.f32 %v3124_v53, %v3710_v26  ;;  %v2103_v5 = vpop.f32.mrb[127].mxu0 }
 0x33a   : > { %2882 = vmatpush3.bf16.xpose.msra.mxu1 %v2398_v58  ;;  %vm2175_vm8 = vcmp.gt.f32.partialorder %v2101_v47, 0.0  ;;  %v2239_v9 = vmul.f32 0.01, %v2101_v47  ;;  %v2104_v14 = vadd.f32 %v3710_v26, %v2103_v5  ;;  %v2404_v26 = vsel %vm1729_vm6, %v2328_v33, 0 }
 0x33b   : > { %3137 = vmatprep.subr.msk.bf16.mxu1 %vm1729_vm6, %v2335_v8  ;;  %v2305_v48 = vsel %vm2177_vm7, %v2109_v45, %v2241_v60  ;;  %vm2178_vm9 = vcmp.gt.f32.partialorder %v2112_v4, 0.0  ;;  %v2242_v61 = vmul.f32 0.01, %v2112_v4  ;;  %v2546_v8 = vsub.s32 %v2543_v13, %v2528_v50 }
 0x33c   : > { %v2303_v0 = vsel %vm2175_vm8, %v2101_v47, %v2239_v9  ;;  %vm2176_vm10 = vcmp.gt.f32.partialorder %v2104_v14, 0.0  ;;  %v2240_v39 = vmul.f32 0.01, %v2104_v14 }
 0x33d   : > { %v2306_v40 = vsel %vm2178_vm9, %v2112_v4, %v2242_v61 }
 0x33e   : > { %v2339_v17 = vpack.c.bf16 %v2306_v40, %v2305_v48  ;;  %v2304_v1 = vsel %vm2176_vm10, %v2104_v14, %v2240_v39 }
 0x33f   : > { %v2338_v56 = vpack.c.bf16 %v2304_v1, %v2303_v0 }
 0x342   : > { %2884 = vmatpush3.bf16.xpose.msra.mxu1 %v2401_v59 }
 0x343   : > { %3138 = vmatprep.subr.msk.bf16.mxu1 %vm1729_vm6, %v2336_v44 }
 0x34a   : > { %2886 = vmatpush3.bf16.xpose.msra.mxu1 %v2404_v26 }
 0x34b   : > { %3139 = vmatprep.subr.msk.bf16.mxu1 %vm1729_vm6, %v2337_v19 }
 0x352   : > { %2888 = vmatpush3.bf16.xpose.msra.mxu1 %v2407_v2 }
 0x353   : > { %3140 = vmatprep.subr.msk.bf16.mxu1 %vm1729_vm6, %v2338_v56 }
 0x35a   : > { %2890 = vmatpush3.bf16.xpose.msra.mxu1 %v2410_v52 }
 0x35b   : > { %3141 = vmatprep.subr.msk.bf16.mxu1 %vm1729_vm6, %v2339_v17 }
 0x35d   : > { %v2525_v15 = vpop.permute.xlu0 %2524 }
 0x35e   : > { %v2530_v20 = vrot.slane %v2525_v15, %v2529_v54 }
 0x362   : > { %2892 = vmatpush3.bf16.xpose.msra.mxu1 %v2413_v57 }
 0x369   : > { %2894 = vmatmul.mubr.msk.bf16.vlgmr.msra.gmra.mrb[68].mxu1 %vm1729_vm6, %v3703_v63  ;;  %vm2566_vm6 = vcmp.lt.s32.totalorder %v2527_v42, 512 }
 0x3fc   : > { %v2473_v62 = vpop.f32.mrb[64].mxu1 }
 0x3fd   : > { %v2475_v33 = vpop.f32.mrb[65].mxu1  ;;  %v2531_v24 = vadd.f32 %v2530_v20, %v2473_v62 }
 0x3fe   : > { %v2477_v25 = vpop.f32.mrb[66].mxu1  ;;  %v2532_v55 = vadd.f32 %v2530_v20, %v2475_v33 }
 0x3ff   : > { %v2478_v31 = vpop.f32.mrb[67].mxu1 }
 0x400   : > { %v2539_v35 = vcombine.low %v2531_v24, %v2532_v55 }
 0x402   : > { %v2547_v6 = vrot.slane %v2539_v35, %v2546_v8 }
 0x43c   : > { %v2514_v23 = vpop.f32.mrb[68].mxu1 }
 0x43d   : > { %v2533_v63 = vadd.f32 %v2530_v20, %v2514_v23  ;;  %v2516_v3 = vpop.f32.mrb[69].mxu1 }
 0x43e   : > { %v2534_v10 = vadd.f32 %v2530_v20, %v2516_v3  ;;  %v2518_v18 = vpop.f32.mrb[70].mxu1 }
 0x43f   : > { %v2519_v21 = vpop.f32.mrb[71].mxu1 }
 0x440   : > { %v2540_v22 = vcombine.low %v2533_v63, %v2534_v10 }
 0x442   : > { %v2554_v27 = vrot.slane %v2540_v22, %v2546_v8 }
 0x444   : > { %v2555_v28 = vcombine.low %v2547_v6, %v2554_v27 }
 0x446   : > { %v2562_v29 = vrot.slane %v2555_v28, %v2546_v8 }
 0x448   : > { %2568 = vst.msk [vmem:[%s328_s24] sm:$0xf] %vm2566_vm6, %v2562_v29 }
 0x449   : > { %3216 = shalt.err (!%p3213_p3)
}
 0x44a   : > { %s3217_s26 = scalar_lea.hbm %s3990_s29, 64  ;;  %s3221_s23 = scalar_lea.hbm %s4041_s9, 128 }
 0x44b   : > { %p3218_p4 = scmp.ne.s32.totalorder %s3990_s29, %s3217_s26  ;;  %p3222_p9 = scmp.lt.u32.totalorder %s3990_s29, %s4041_s9 }
 0x44c   : > { %p3223_p10 = scmp.lt.u32.totalorder %s3221_s23, %s3217_s26  ;;  %p3225_p12 = scmp.lt.u32.totalorder %s3217_s26, %s3990_s29 }
 0x44d   : > { %p3219_p7 = pnand %p3218_p4, %p3358_p5 }
 0x44e   : > { %p3224_p11 = por %p3223_p10, %p3222_p9 }
 0x44f   : > { %p3220_p8 = pneg %p3219_p7 }
 0x450   : > { %p3226_p13 = por %p3225_p12, %p3224_p11 }
 0x452   : > { %p3227_p0 = pnand %p3226_p13, %p3220_p8 }
 0x454   : > { %3230 = shalt.err (!%p3227_p0)
}
 0x455   : > { %3142 = dma.vmem_to_hbm [thread:$0]  (%p3358_p5), %s3992_s25, 64, %s3990_s29, %s2570_s30  }
 0x456 PF: > { %p3148_p1 = scmp.ge.s32.totalorder %s3265_s14, 2  ;;  %s2596_s28 = sand.u32 1, %s3253_s11  }
 0x457   : > { %s2597_s10 = scalar_lea.sflag [#allocation4], %s2596_s28 }
 0x458   : > { %p3145_p2 = pnand %p3148_p1, %p3362_p6 }
 0x45a   : > { %3248 = dma.done.wait (!%p3145_p2), %s2597_s10, 64  }
 0x45b   : > { %3250 = vsyncadd (!%p3145_p2), %s2597_s10, 4294967232  ;;  %p21_p3 = scmp.ge.s32.totalorder %s3346_s16, 4   ;;  %s4044_s11 = smov %s3257_s12 }
 0x45c   : > { %s4045_s12 = smov %s3261_s13  ;;  %s4046_s13 = smov %s3356_s19 }
 0x45d   : > { %s4047_s14 = smov %s3346_s16  ;;  %23 = sbr.rel (!%p21_p3) target bundleno = 6 (0x6), region = 91 }
 0x464   :  { %2602 = vsyncpa [#allocation4], 1 }
 0x465   :  { %2604 = vsyncpa [#allocation4 + $0x1], 1 }

</bundles_post_ra>
